<compile_context>
chip_gen: v6e
topology: v6e:2x2x1
jax: 0.10.0
libtpu: 0.0.40
codegen_flags: <defaults>
</compile_context>

<pallas_src>
import functools
import math

import jax
import jax.numpy as jnp
import numpy as np
from jax.experimental import pallas as pl
from jax.experimental.pallas import tpu as pltpu

LN_EPS = 1e-5  # torch.nn.LayerNorm default


# ----------------------------- in-kernel helpers -----------------------------

def _mish(x):
    # mish(x) = x * tanh(softplus(x)) = x * (t - 1) / (t + 1),  t = (1 + e^x)^2
    # Single exp + approx reciprocal (both on the EUP slot); clamp avoids inf/inf.
    e = jnp.exp(jnp.minimum(x, 20.0))
    t = (1.0 + e) * (1.0 + e)
    return x * (t - 1.0) * pl.reciprocal(t + 1.0, approx=True)


def _layernorm(x, gamma, beta):
    mu = jnp.mean(x, axis=-1, keepdims=True)
    xc = x - mu
    var = jnp.mean(xc * xc, axis=-1, keepdims=True)
    return xc * jax.lax.rsqrt(var + LN_EPS) * gamma + beta


# --------------------------------- kernels -----------------------------------

def _k_side_kernel(k_ref, wk_ref, bk_ref, wko_ref, kvecs_ref, projk_ref, knew_ref):
    """Per key tile: proj_k (emitted bf16) and k' = k_ln(k + Mish(k_out(proj_k)))."""
    k = k_ref[...].astype(jnp.float32)                                    # (TK, kdim)

    proj = jnp.dot(k_ref[...].astype(jnp.bfloat16), wk_ref[...],          # bf16 MXU, f32 acc
                   preferred_element_type=jnp.float32) + bk_ref[...]      # (TK, H*D) f32
    projk_ref[...] = proj.astype(projk_ref.dtype)                         # bf16 inter-kernel

    # k_out with torch's head<->dim permutation folded into the weight rows (wrapper).
    ko = jnp.dot(proj.astype(jnp.bfloat16), wko_ref[...],
                 preferred_element_type=jnp.float32) + kvecs_ref[0:1, :]  # (TK, kdim)
    y = k + _mish(ko)
    knew_ref[...] = _layernorm(y, kvecs_ref[1:2, :], kvecs_ref[2:3, :]).astype(knew_ref.dtype)


def _q_attn_kernel(q_ref, projk_ref, vsum_ref, wq_ref, bq_ref, wqo_ref, qvecs_ref,
                   qnew_ref, meanv_ref, *, num_heads, head_dim, vdim, exp_dtype):
    """Per query tile: proj_q, per-head softmax attention vs resident K, q', mean(values)."""
    q = q_ref[...].astype(jnp.float32)                                    # (TQ, qdim)

    proj = jnp.dot(q_ref[...].astype(jnp.bfloat16), wq_ref[...],
                   preferred_element_type=jnp.float32) + bq_ref[...]      # (TQ, H*D) f32
    projb = proj.astype(jnp.bfloat16)
    vrow = vsum_ref[...]                                                  # (1, Nk) f32

    inv_sqrt_d = 1.0 / math.sqrt(head_dim)
    mv = jnp.zeros((proj.shape[0], 1), jnp.float32)
    for h in range(num_heads):                              # small static unroll (H is small)
        sl = slice(h * head_dim, (h + 1) * head_dim)
        # Per-head ref-view slice: only (Nk, D) of the resident bf16 K is loaded per head.
        logits = jax.lax.dot_general(                                     # q_h @ k_h^T on MXU
            projb[:, sl], projk_ref[:, sl],
            dimension_numbers=(((1,), (1,)), ((), ())),
            preferred_element_type=jnp.float32) * inv_sqrt_d              # (TQ, Nk) f32
        m = jnp.max(logits, axis=-1, keepdims=True)
        # exp in bf16 on v6e/v7x (EUP slot relief), f32 accumulation either way.
        e = jnp.exp((logits - m).astype(exp_dtype)).astype(jnp.float32)
        denom = jnp.sum(e, axis=-1, keepdims=True)                        # (TQ, 1)
        num = jnp.sum(e * vrow, axis=-1, keepdims=True)                   # VPU mul + XLU reduce
        mv = mv + num * pl.reciprocal(denom, approx=True)                 # one recip per row
    meanv_ref[...] = (mv * (1.0 / (num_heads * vdim))).astype(meanv_ref.dtype)

    # q_out with the permutation folded into the weight rows (wrapper).
    qo = jnp.dot(projb, wqo_ref[...],
                 preferred_element_type=jnp.float32) + qvecs_ref[0:1, :]  # (TQ, qdim)
    y = q + _mish(qo)
    qnew_ref[...] = _layernorm(y, qvecs_ref[1:2, :], qvecs_ref[2:3, :]).astype(qnew_ref.dtype)


# --------------------------------- wrapper ------------------------------------

def _fold_head_permutation(w, num_heads, head_dim):
    """Rows of w are indexed d*H + h (torch's proj.permute(1,2,0) flatten); reorder them to
    h*D + d so the kernel can feed the un-permuted (row-major head) projection directly."""
    out_dim = w.shape[1]
    w = w.reshape(head_dim, num_heads, out_dim)           # [d, h, :]
    return jnp.transpose(w, (1, 0, 2)).reshape(num_heads * head_dim, out_dim)


def _device_budget():
    """Generation-aware VMEM limit, token-tile caps and softmax-exp dtype."""
    kind = ""
    try:
        kind = jax.devices()[0].device_kind.lower()
    except Exception:
        pass
    if "v2" in kind or "v3" in kind:
        vmem_cap = 16 * 2 ** 20
    elif "7" in kind:                       # v7x: 64 MiB VMEM per TensorCore
        vmem_cap = 64 * 2 ** 20
    else:                                   # v4 / v5e / v6e: 128 MiB
        vmem_cap = 128 * 2 ** 20
    try:
        vmem_cap = int(pltpu.get_tpu_info().vmem_capacity_bytes)
    except Exception:
        pass
    vmem_limit = min(112 * 2 ** 20, max(12 * 2 ** 20, (vmem_cap * 3) // 4))
    if vmem_cap >= 96 * 2 ** 20:            # v5e / v6e: plenty of VMEM -> big tiles
        q_cap, k_cap = 512, 1024
    else:                                   # v7x (or smaller): conservative tile budget
        q_cap, k_cap = 256, 512
    # bf16 exp only where the EUP supports packed bf16 (v6e / v7x); f32 elsewhere (v5e...).
    exp_dtype = jnp.bfloat16 if ("v6" in kind or "7" in kind) else jnp.float32
    return int(vmem_limit), q_cap, k_cap, exp_dtype


def _pick_tile(n, cap):
    """>=2 grid steps once there's enough work (keeps both v7x TCs busy), multiples of 16
    (bf16 sublane packing), capped by the per-generation budget."""
    if n <= 64:
        return int(n)                       # single full-extent block
    t = ((-(-n // 2)) + 15) // 16 * 16
    return int(max(16, min(cap, t)))


def _const_spec(shape, single_buffer):
    """BlockSpec for an operand whose block never changes across the grid."""
    ndim = len(shape)
    if single_buffer:
        # Invariant operand: one buffer is enough -> halve its VMEM footprint.
        return pl.BlockSpec(shape, lambda i: (0,) * ndim, pipeline_mode=pl.Buffered(1))
    return pl.BlockSpec(shape, lambda i: (0,) * ndim)


def _forward_impl(q, k, v, params, *, num_heads, head_dim, single_buffer_constants):
    Nq, qdim = q.shape
    Nk, kdim = k.shape
    _, vdim = v.shape
    hd = num_heads * head_dim

    vmem_limit, q_cap, k_cap, exp_dtype = _device_budget()

    # ---- parameter packing (layout plumbing stays outside the kernel) ----
    wq = params["wq"].astype(jnp.bfloat16)                                 # (qdim, H*D)
    wk = params["wk"].astype(jnp.bfloat16)                                 # (kdim, H*D)
    wqo = _fold_head_permutation(params["wqo"], num_heads, head_dim).astype(jnp.bfloat16)
    wko = _fold_head_permutation(params["wko"], num_heads, head_dim).astype(jnp.bfloat16)
    bq = params["bq"].reshape(1, hd).astype(jnp.float32)
    bk = params["bk"].reshape(1, hd).astype(jnp.float32)
    qvecs = jnp.stack([params["bqo"], params["gq"], params["bgq"]]).astype(jnp.float32)  # (3, qdim)
    kvecs = jnp.stack([params["bko"], params["gk"], params["bgk"]]).astype(jnp.float32)  # (3, kdim)

    # rowsum(v) as a lane-dense (1, Nk) row, computed in plain JAX: removes one DMA stream
    # and a lane-sparse (tk, 1) masked-store output from kernel 1, and is exactly the layout
    # kernel 2's VPU multiply + lane reduction wants.
    vsum = jnp.sum(v.astype(jnp.float32), axis=-1)[None, :]               # (1, Nk)

    tk = _pick_tile(Nk, k_cap)
    tq = _pick_tile(Nq, q_cap)

    cparams = pltpu.CompilerParams(dimension_semantics=("parallel",),
                                   vmem_limit_bytes=vmem_limit)
    row = lambda i: (i, 0)
    sb = single_buffer_constants

    # ---- kernel 1: key-side projection (bf16 out) + residual/LN ----
    projk, k_new = pl.pallas_call(
        _k_side_kernel,
        out_shape=(jax.ShapeDtypeStruct((Nk, hd), jnp.bfloat16),   # bf16 inter-kernel tensor
                   jax.ShapeDtypeStruct((Nk, kdim), k.dtype)),
        grid=(pl.cdiv(Nk, tk),),
        in_specs=[pl.BlockSpec((tk, kdim), row),
                  _const_spec((kdim, hd), sb),
                  _const_spec((1, hd), sb),
                  _const_spec((hd, kdim), sb),
                  _const_spec((3, kdim), sb)],
        out_specs=(pl.BlockSpec((tk, hd), row),
                   pl.BlockSpec((tk, kdim), row)),
        compiler_params=cparams,
    )(k, wk, bk, wko, kvecs)

    # ---- kernel 2: query-side projection + attention + residual/LN ----
    kern2 = functools.partial(_q_attn_kernel, num_heads=num_heads,
                              head_dim=head_dim, vdim=vdim, exp_dtype=exp_dtype)
    q_new, mean_v = pl.pallas_call(
        kern2,
        out_shape=(jax.ShapeDtypeStruct((Nq, qdim), q.dtype),
                   jax.ShapeDtypeStruct((Nq, 1), jnp.float32)),
        grid=(pl.cdiv(Nq, tq),),
        in_specs=[pl.BlockSpec((tq, qdim), row),
                  _const_spec((Nk, hd), sb),      # resident bf16 proj_k across query tiles
                  _const_spec((1, Nk), sb),       # resident rowsum(v)
                  _const_spec((qdim, hd), sb),
                  _const_spec((1, hd), sb),
                  _const_spec((hd, qdim), sb),
                  _const_spec((3, qdim), sb)],
        out_specs=(pl.BlockSpec((tq, qdim), row),
                   pl.BlockSpec((tq, 1), row)),
        compiler_params=cparams,
    )(q, projk, vsum, wq, bq, wqo, qvecs)

    # Block here so any deferred error surfaces inside the caller's fallback guard.
    q_new, k_new, mean_v = jax.block_until_ready((q_new, k_new, mean_v))
    return q_new, k_new, mean_v, None


def crakn_encoder_forward(q, k, v, params, *, num_heads, head_dim, mask=None, bias=None):
    """Returns (q', k', mean_values, None) matching CrAKNEncoder.forward(q, k, v)."""
    if mask is not None or bias is not None:
        # TODO(synk): mask / bias (bias_proj + bias_out) paths are not implemented.
        raise NotImplementedError("mask/bias paths are not implemented in the Pallas kernel")
    try:
        return _forward_impl(q, k, v, params, num_heads=num_heads, head_dim=head_dim,
                             single_buffer_constants=True)
    except Exception:
        # pl.Buffered(1) single-buffering of invariant operands not supported by this
        # jax/libtpu combination -> fall back to default double buffering (same semantics).
        return _forward_impl(q, k, v, params, num_heads=num_heads, head_dim=head_dim,
                             single_buffer_constants=False)


# ------------------------- synthetic params & reference ------------------------

def make_params(qdim, kdim, vdim, num_heads, head_dim, key):
    """Synthetic parameters with torch-like init (v_proj/v_out/v_ln/o_proj/norm unused by forward)."""
    del vdim
    hd = num_heads * head_dim
    ks = jax.random.split(key, 10)

    def xavier(kk, fan_in, fan_out):
        a = math.sqrt(6.0 / (fan_in + fan_out))
        return jax.random.uniform(kk, (fan_in, fan_out), jnp.float32, -a, a)

    bo = 1.0 / math.sqrt(hd)
    return dict(
        wq=xavier(ks[0], qdim, hd), bq=jnp.zeros((hd,), jnp.float32),
        wk=xavier(ks[1], kdim, hd), bk=jnp.zeros((hd,), jnp.float32),
        # q_out / k_out weights stored in torch's (d*H + h) input ordering, as (in, out)
        wqo=jax.random.uniform(ks[2], (hd, qdim), jnp.float32, -bo, bo),
        bqo=jax.random.uniform(ks[3], (qdim,), jnp.float32, -bo, bo),
        wko=jax.random.uniform(ks[4], (hd, kdim), jnp.float32, -bo, bo),
        bko=jax.random.uniform(ks[5], (kdim,), jnp.float32, -bo, bo),
        gq=1.0 + 0.1 * jax.random.normal(ks[6], (qdim,), jnp.float32),
        bgq=0.05 * jax.random.normal(ks[7], (qdim,), jnp.float32),
        gk=1.0 + 0.1 * jax.random.normal(ks[8], (kdim,), jnp.float32),
        bgk=0.05 * jax.random.normal(ks[9], (kdim,), jnp.float32),
    )


def reference_forward(q, k, v, params, *, num_heads, head_dim):
    """Pure-JAX (f32) replica of CrAKNEncoder.forward with mask=None, bias=None."""
    H, D = num_heads, head_dim
    Nq, Nk, vdim = q.shape[0], k.shape[0], v.shape[1]

    proj_q = (q @ params["wq"] + params["bq"]).reshape(Nq, H, D).transpose(1, 0, 2)  # (H,Nq,D)
    proj_k = (k @ params["wk"] + params["bk"]).reshape(Nk, H, D).transpose(1, 0, 2)  # (H,Nk,D)
    proj_v = jnp.broadcast_to(v[None], (H, Nk, vdim))

    logits = jnp.einsum("hqd,hkd->hqk", proj_q, proj_k) / math.sqrt(D)
    attn = jax.nn.softmax(logits, axis=-1)
    values = jnp.einsum("hqk,hkd->hqd", attn, proj_v)
    values = values.transpose(1, 0, 2).reshape(Nq, H * vdim)
    mean_v = jnp.mean(values, axis=-1, keepdims=True)

    pq = proj_q.transpose(1, 2, 0).reshape(Nq, D * H)   # torch's permute(1,2,0) flatten
    pk = proj_k.transpose(1, 2, 0).reshape(Nk, D * H)

    def mish(x):
        return x * jnp.tanh(jax.nn.softplus(x))

    def ln(x, g, b):
        mu = jnp.mean(x, axis=-1, keepdims=True)
        var = jnp.mean((x - mu) ** 2, axis=-1, keepdims=True)
        return (x - mu) * jax.lax.rsqrt(var + LN_EPS) * g + b

    q_new = ln(q + mish(pq @ params["wqo"] + params["bqo"]), params["gq"], params["bgq"])
    k_new = ln(k + mish(pk @ params["wko"] + params["bko"]), params["gk"], params["bgk"])
    return q_new, k_new, mean_v, None


# ----------------------------------- main --------------------------------------

if __name__ == "__main__":
    num_heads, head_dim = 4, 16
    qdim, kdim, vdim = 32, 48, 40
    # Large enough that both 1-D "parallel" grids run >= 2 tiles (exercises the multi-step
    # path and v7x's dual-TensorCore split) while staying small and fast.
    Nq, Nk = 128, 192

    key = jax.random.PRNGKey(0)
    kq, kk, kv, kp = jax.random.split(key, 4)
    q = jax.random.normal(kq, (Nq, qdim), jnp.float32)
    k = jax.random.normal(kk, (Nk, kdim), jnp.float32)
    v = jax.random.normal(kv, (Nk, vdim), jnp.float32)
    params = make_params(qdim, kdim, vdim, num_heads, head_dim, kp)

    out = crakn_encoder_forward(q, k, v, params, num_heads=num_heads, head_dim=head_dim)
    out = jax.block_until_ready(out)

    ref = jax.block_until_ready(
        reference_forward(q, k, v, params, num_heads=num_heads, head_dim=head_dim))

    # bf16 MXU operands + bf16 inter-kernel proj_k + approx reciprocals (and bf16 exp on
    # v6e/v7x) vs an f32 reference -> loose-ish tolerance.
    for got, want, name in zip(out[:3], ref[:3], ("q_new", "k_new", "mean_values")):
        np.testing.assert_allclose(np.asarray(got), np.asarray(want),
                                   rtol=2e-2, atol=2e-2, err_msg=name)
    assert out[3] is None and ref[3] is None

    print("KERNEL_OK")
</pallas_src>

<mosaic_0001>
module attributes {stable_mosaic.version = 11 : i64} {
  func.func @_k_side_kernel(%arg0: i32, %arg1: memref<96x48xf32, #tpu.memory_space<vmem>>, %arg2: memref<48x64xbf16, #tpu.memory_space<vmem>>, %arg3: memref<1x64xf32, #tpu.memory_space<vmem>>, %arg4: memref<64x48xbf16, #tpu.memory_space<vmem>>, %arg5: memref<3x48xf32, #tpu.memory_space<vmem>>, %arg6: memref<96x64xbf16, #tpu.memory_space<vmem>>, %arg7: memref<96x48xf32, #tpu.memory_space<vmem>>) attributes {dimension_semantics = [#tpu.dimension_semantics<parallel>], iteration_bounds = array<i64: 2>, scalar_prefetch = 0 : i64, scratch_operands = 0 : i64, tpu.core_type = #tpu.core_type<tc>, window_params = [{transform_indices = @transform_0, window_bounds = array<i64: 96, 48>}, {pipeline_mode = #tpu.pipeline_mode<synchronous>, transform_indices = @transform_1, window_bounds = array<i64: 48, 64>}, {pipeline_mode = #tpu.pipeline_mode<synchronous>, transform_indices = @transform_2, window_bounds = array<i64: 1, 64>}, {pipeline_mode = #tpu.pipeline_mode<synchronous>, transform_indices = @transform_3, window_bounds = array<i64: 64, 48>}, {pipeline_mode = #tpu.pipeline_mode<synchronous>, transform_indices = @transform_4, window_bounds = array<i64: 3, 48>}, {transform_indices = @transform_5, window_bounds = array<i64: 96, 64>}, {transform_indices = @transform_6, window_bounds = array<i64: 96, 48>}]} {
    %c0 = arith.constant 0 : index
    %c0_0 = arith.constant 0 : index
    %0 = vector.load %arg1[%c0, %c0_0] : memref<96x48xf32, #tpu.memory_space<vmem>>, vector<96x48xf32>
    %c0_1 = arith.constant 0 : index
    %c0_2 = arith.constant 0 : index
    %1 = vector.load %arg1[%c0_1, %c0_2] : memref<96x48xf32, #tpu.memory_space<vmem>>, vector<96x48xf32>
    %2 = arith.truncf %1 : vector<96x48xf32> to vector<96x48xbf16>
    %c0_3 = arith.constant 0 : index
    %c0_4 = arith.constant 0 : index
    %3 = vector.load %arg2[%c0_3, %c0_4] : memref<48x64xbf16, #tpu.memory_space<vmem>>, vector<48x64xbf16>
    %cst = arith.constant dense<0.000000e+00> : vector<96x64xf32>
    %4 = tpu.matmul %2, %3, %cst {dimension_numbers = #tpu.dot_dimension_numbers<[1], [0], [0], [1], [0, 0, 1, 1], [], []>} : vector<96x48xbf16>, vector<48x64xbf16>, vector<96x64xf32> -> vector<96x64xf32>
    %c0_5 = arith.constant 0 : index
    %c0_6 = arith.constant 0 : index
    %5 = vector.load %arg3[%c0_5, %c0_6] : memref<1x64xf32, #tpu.memory_space<vmem>>, vector<1x64xf32>
    %6 = vector.broadcast %5 : vector<1x64xf32> to vector<96x64xf32>
    %7 = arith.addf %4, %6 : vector<96x64xf32>
    %8 = arith.truncf %7 : vector<96x64xf32> to vector<96x64xbf16>
    %c0_7 = arith.constant 0 : index
    %c0_8 = arith.constant 0 : index
    %9 = vector.load %arg6[%c0_7, %c0_8] : memref<96x64xbf16, #tpu.memory_space<vmem>>, vector<96x64xbf16>
    tpu.vector_store %arg6[%c0_7, %c0_8], %8 {strides = array<i32>} : memref<96x64xbf16, #tpu.memory_space<vmem>>, vector<96x64xbf16>,
    %10 = arith.truncf %7 : vector<96x64xf32> to vector<96x64xbf16>
    %c0_9 = arith.constant 0 : index
    %c0_10 = arith.constant 0 : index
    %11 = vector.load %arg4[%c0_9, %c0_10] : memref<64x48xbf16, #tpu.memory_space<vmem>>, vector<64x48xbf16>
    %cst_11 = arith.constant dense<0.000000e+00> : vector<96x48xf32>
    %12 = tpu.matmul %10, %11, %cst_11 {dimension_numbers = #tpu.dot_dimension_numbers<[1], [0], [0], [1], [0, 0, 1, 1], [], []>} : vector<96x64xbf16>, vector<64x48xbf16>, vector<96x48xf32> -> vector<96x48xf32>
    %c0_12 = arith.constant 0 : index
    %c0_13 = arith.constant 0 : index
    %13 = vector.load %arg5[%c0_12, %c0_13] : memref<3x48xf32, #tpu.memory_space<vmem>>, vector<1x48xf32>
    %14 = vector.broadcast %13 : vector<1x48xf32> to vector<96x48xf32>
    %15 = arith.addf %12, %14 : vector<96x48xf32>
    %cst_14 = arith.constant 2.000000e+01 : f32
    %16 = vector.broadcast %cst_14 : f32 to vector<96x48xf32>
    %17 = arith.minimumf %15, %16 : vector<96x48xf32>
    %18 = math.exp %17 : vector<96x48xf32>
    %cst_15 = arith.constant 1.000000e+00 : f32
    %19 = vector.broadcast %cst_15 : f32 to vector<96x48xf32>
    %20 = arith.addf %19, %18 : vector<96x48xf32>
    %cst_16 = arith.constant 1.000000e+00 : f32
    %21 = vector.broadcast %cst_16 : f32 to vector<96x48xf32>
    %22 = arith.addf %21, %18 : vector<96x48xf32>
    %23 = arith.mulf %20, %22 : vector<96x48xf32>
    %cst_17 = arith.constant 1.000000e+00 : f32
    %24 = vector.broadcast %cst_17 : f32 to vector<96x48xf32>
    %25 = arith.subf %23, %24 : vector<96x48xf32>
    %26 = arith.mulf %15, %25 : vector<96x48xf32>
    %cst_18 = arith.constant 1.000000e+00 : f32
    %27 = vector.broadcast %cst_18 : f32 to vector<96x48xf32>
    %28 = arith.addf %23, %27 : vector<96x48xf32>
    %29 = tpu.reciprocal %28 {approx = true} : vector<96x48xf32> -> vector<96x48xf32>
    %30 = arith.mulf %26, %29 : vector<96x48xf32>
    %31 = arith.addf %0, %30 : vector<96x48xf32>
    %c1 = arith.constant 1 : index
    %c0_19 = arith.constant 0 : index
    %32 = vector.load %arg5[%c1, %c0_19] : memref<3x48xf32, #tpu.memory_space<vmem>>, vector<1x48xf32>
    %c2 = arith.constant 2 : index
    %c0_20 = arith.constant 0 : index
    %33 = vector.load %arg5[%c2, %c0_20] : memref<3x48xf32, #tpu.memory_space<vmem>>, vector<1x48xf32>
    %cst_21 = arith.constant dense<0.000000e+00> : vector<96xf32>
    %34 = vector.multi_reduction <add>, %31, %cst_21 [1] : vector<96x48xf32> to vector<96xf32>
    %35 = vector.shape_cast %34 : vector<96xf32> to vector<96x1xf32>
    %cst_22 = arith.constant 4.800000e+01 : f32
    %36 = vector.broadcast %cst_22 : f32 to vector<96x1xf32>
    %37 = arith.divf %35, %36 : vector<96x1xf32>
    %38 = vector.broadcast %37 : vector<96x1xf32> to vector<96x48xf32>
    %39 = arith.subf %31, %38 : vector<96x48xf32>
    %40 = arith.mulf %39, %39 : vector<96x48xf32>
    %cst_23 = arith.constant dense<0.000000e+00> : vector<96xf32>
    %41 = vector.multi_reduction <add>, %40, %cst_23 [1] : vector<96x48xf32> to vector<96xf32>
    %42 = vector.shape_cast %41 : vector<96xf32> to vector<96x1xf32>
    %cst_24 = arith.constant 4.800000e+01 : f32
    %43 = vector.broadcast %cst_24 : f32 to vector<96x1xf32>
    %44 = arith.divf %42, %43 : vector<96x1xf32>
    %cst_25 = arith.constant 9.99999974E-6 : f32
    %45 = vector.broadcast %cst_25 : f32 to vector<96x1xf32>
    %46 = arith.addf %44, %45 : vector<96x1xf32>
    %47 = math.rsqrt %46 : vector<96x1xf32>
    %48 = vector.broadcast %47 : vector<96x1xf32> to vector<96x48xf32>
    %49 = arith.mulf %39, %48 : vector<96x48xf32>
    %50 = vector.broadcast %32 : vector<1x48xf32> to vector<96x48xf32>
    %51 = arith.mulf %49, %50 : vector<96x48xf32>
    %52 = vector.broadcast %33 : vector<1x48xf32> to vector<96x48xf32>
    %53 = arith.addf %51, %52 : vector<96x48xf32>
    %c0_26 = arith.constant 0 : index
    %c0_27 = arith.constant 0 : index
    %54 = vector.load %arg7[%c0_26, %c0_27] : memref<96x48xf32, #tpu.memory_space<vmem>>, vector<96x48xf32>
    tpu.vector_store %arg7[%c0_26, %c0_27], %53 {strides = array<i32>} : memref<96x48xf32, #tpu.memory_space<vmem>>, vector<96x48xf32>,
    return
  }
  func.func @transform_0(%arg0: i32) -> (i32, i32) {
    %c0_i32 = arith.constant 0 : i32
    %c0_i32_0 = arith.constant 0 : i32
    return %arg0, %c0_i32 : i32, i32
  }
  func.func @transform_1(%arg0: i32) -> (i32, i32) {
    %c0_i32 = arith.constant 0 : i32
    %c0_i32_0 = arith.constant 0 : i32
    %c0_i32_1 = arith.constant 0 : i32
    return %c0_i32, %c0_i32_0 : i32, i32
  }
  func.func @transform_2(%arg0: i32) -> (i32, i32) {
    %c0_i32 = arith.constant 0 : i32
    %c0_i32_0 = arith.constant 0 : i32
    %c0_i32_1 = arith.constant 0 : i32
    return %c0_i32, %c0_i32_0 : i32, i32
  }
  func.func @transform_3(%arg0: i32) -> (i32, i32) {
    %c0_i32 = arith.constant 0 : i32
    %c0_i32_0 = arith.constant 0 : i32
    %c0_i32_1 = arith.constant 0 : i32
    return %c0_i32, %c0_i32_0 : i32, i32
  }
  func.func @transform_4(%arg0: i32) -> (i32, i32) {
    %c0_i32 = arith.constant 0 : i32
    %c0_i32_0 = arith.constant 0 : i32
    %c0_i32_1 = arith.constant 0 : i32
    return %c0_i32, %c0_i32_0 : i32, i32
  }
  func.func @transform_5(%arg0: i32) -> (i32, i32) {
    %c0_i32 = arith.constant 0 : i32
    %c0_i32_0 = arith.constant 0 : i32
    return %arg0, %c0_i32 : i32, i32
  }
  func.func @transform_6(%arg0: i32) -> (i32, i32) {
    %c0_i32 = arith.constant 0 : i32
    %c0_i32_0 = arith.constant 0 : i32
    return %arg0, %c0_i32 : i32, i32
  }
}

module attributes {stable_mosaic.version = 11 : i64} {
  func.func @_k_side_kernel(%arg0: i32, %arg1: memref<96x48xf32, #tpu.memory_space<vmem>>, %arg2: memref<48x64xbf16, #tpu.memory_space<vmem>>, %arg3: memref<1x64xf32, #tpu.memory_space<vmem>>, %arg4: memref<64x48xbf16, #tpu.memory_space<vmem>>, %arg5: memref<3x48xf32, #tpu.memory_space<vmem>>, %arg6: memref<96x64xbf16, #tpu.memory_space<vmem>>, %arg7: memref<96x48xf32, #tpu.memory_space<vmem>>) attributes {dimension_semantics = [#tpu.dimension_semantics<parallel>], iteration_bounds = array<i64: 2>, scalar_prefetch = 0 : i64, scratch_operands = 0 : i64, tpu.core_type = #tpu.core_type<tc>, window_params = [{transform_indices = @transform_0, window_bounds = array<i64: 96, 48>}, {pipeline_mode = #tpu.pipeline_mode<synchronous>, transform_indices = @transform_1, window_bounds = array<i64: 48, 64>}, {pipeline_mode = #tpu.pipeline_mode<synchronous>, transform_indices = @transform_2, window_bounds = array<i64: 1, 64>}, {pipeline_mode = #tpu.pipeline_mode<synchronous>, transform_indices = @transform_3, window_bounds = array<i64: 64, 48>}, {pipeline_mode = #tpu.pipeline_mode<synchronous>, transform_indices = @transform_4, window_bounds = array<i64: 3, 48>}, {transform_indices = @transform_5, window_bounds = array<i64: 96, 64>}, {transform_indices = @transform_6, window_bounds = array<i64: 96, 48>}]} {
    %c0 = arith.constant 0 : index
    %c0_0 = arith.constant 0 : index
    %0 = vector.load %arg1[%c0, %c0_0] : memref<96x48xf32, #tpu.memory_space<vmem>>, vector<96x48xf32>
    %c0_1 = arith.constant 0 : index
    %c0_2 = arith.constant 0 : index
    %1 = vector.load %arg1[%c0_1, %c0_2] : memref<96x48xf32, #tpu.memory_space<vmem>>, vector<96x48xf32>
    %2 = arith.truncf %1 : vector<96x48xf32> to vector<96x48xbf16>
    %c0_3 = arith.constant 0 : index
    %c0_4 = arith.constant 0 : index
    %3 = vector.load %arg2[%c0_3, %c0_4] : memref<48x64xbf16, #tpu.memory_space<vmem>>, vector<48x64xbf16>
    %cst = arith.constant dense<0.000000e+00> : vector<96x64xf32>
    %4 = tpu.matmul %2, %3, %cst {dimension_numbers = #tpu.dot_dimension_numbers<[1], [0], [0], [1], [0, 0, 1, 1], [], []>} : vector<96x48xbf16>, vector<48x64xbf16>, vector<96x64xf32> -> vector<96x64xf32>
    %c0_5 = arith.constant 0 : index
    %c0_6 = arith.constant 0 : index
    %5 = vector.load %arg3[%c0_5, %c0_6] : memref<1x64xf32, #tpu.memory_space<vmem>>, vector<1x64xf32>
    %6 = vector.broadcast %5 : vector<1x64xf32> to vector<96x64xf32>
    %7 = arith.addf %4, %6 : vector<96x64xf32>
    %8 = arith.truncf %7 : vector<96x64xf32> to vector<96x64xbf16>
    %c0_7 = arith.constant 0 : index
    %c0_8 = arith.constant 0 : index
    %9 = vector.load %arg6[%c0_7, %c0_8] : memref<96x64xbf16, #tpu.memory_space<vmem>>, vector<96x64xbf16>
    tpu.vector_store %arg6[%c0_7, %c0_8], %8 {strides = array<i32>} : memref<96x64xbf16, #tpu.memory_space<vmem>>, vector<96x64xbf16>,
    %10 = arith.truncf %7 : vector<96x64xf32> to vector<96x64xbf16>
    %c0_9 = arith.constant 0 : index
    %c0_10 = arith.constant 0 : index
    %11 = vector.load %arg4[%c0_9, %c0_10] : memref<64x48xbf16, #tpu.memory_space<vmem>>, vector<64x48xbf16>
    %cst_11 = arith.constant dense<0.000000e+00> : vector<96x48xf32>
    %12 = tpu.matmul %10, %11, %cst_11 {dimension_numbers = #tpu.dot_dimension_numbers<[1], [0], [0], [1], [0, 0, 1, 1], [], []>} : vector<96x64xbf16>, vector<64x48xbf16>, vector<96x48xf32> -> vector<96x48xf32>
    %c0_12 = arith.constant 0 : index
    %c0_13 = arith.constant 0 : index
    %13 = vector.load %arg5[%c0_12, %c0_13] : memref<3x48xf32, #tpu.memory_space<vmem>>, vector<1x48xf32>
    %14 = vector.broadcast %13 : vector<1x48xf32> to vector<96x48xf32>
    %15 = arith.addf %12, %14 : vector<96x48xf32>
    %cst_14 = arith.constant 2.000000e+01 : f32
    %16 = vector.broadcast %cst_14 : f32 to vector<96x48xf32>
    %17 = arith.minimumf %15, %16 : vector<96x48xf32>
    %18 = math.exp %17 : vector<96x48xf32>
    %cst_15 = arith.constant 1.000000e+00 : f32
    %19 = vector.broadcast %cst_15 : f32 to vector<96x48xf32>
    %20 = arith.addf %19, %18 : vector<96x48xf32>
    %cst_16 = arith.constant 1.000000e+00 : f32
    %21 = vector.broadcast %cst_16 : f32 to vector<96x48xf32>
    %22 = arith.addf %21, %18 : vector<96x48xf32>
    %23 = arith.mulf %20, %22 : vector<96x48xf32>
    %cst_17 = arith.constant 1.000000e+00 : f32
    %24 = vector.broadcast %cst_17 : f32 to vector<96x48xf32>
    %25 = arith.subf %23, %24 : vector<96x48xf32>
    %26 = arith.mulf %15, %25 : vector<96x48xf32>
    %cst_18 = arith.constant 1.000000e+00 : f32
    %27 = vector.broadcast %cst_18 : f32 to vector<96x48xf32>
    %28 = arith.addf %23, %27 : vector<96x48xf32>
    %29 = tpu.reciprocal %28 {approx = true} : vector<96x48xf32> -> vector<96x48xf32>
    %30 = arith.mulf %26, %29 : vector<96x48xf32>
    %31 = arith.addf %0, %30 : vector<96x48xf32>
    %c1 = arith.constant 1 : index
    %c0_19 = arith.constant 0 : index
    %32 = vector.load %arg5[%c1, %c0_19] : memref<3x48xf32, #tpu.memory_space<vmem>>, vector<1x48xf32>
    %c2 = arith.constant 2 : index
    %c0_20 = arith.constant 0 : index
    %33 = vector.load %arg5[%c2, %c0_20] : memref<3x48xf32, #tpu.memory_space<vmem>>, vector<1x48xf32>
    %cst_21 = arith.constant dense<0.000000e+00> : vector<96xf32>
    %34 = vector.multi_reduction <add>, %31, %cst_21 [1] : vector<96x48xf32> to vector<96xf32>
    %35 = vector.shape_cast %34 : vector<96xf32> to vector<96x1xf32>
    %cst_22 = arith.constant 4.800000e+01 : f32
    %36 = vector.broadcast %cst_22 : f32 to vector<96x1xf32>
    %37 = arith.divf %35, %36 : vector<96x1xf32>
    %38 = vector.broadcast %37 : vector<96x1xf32> to vector<96x48xf32>
    %39 = arith.subf %31, %38 : vector<96x48xf32>
    %40 = arith.mulf %39, %39 : vector<96x48xf32>
    %cst_23 = arith.constant dense<0.000000e+00> : vector<96xf32>
    %41 = vector.multi_reduction <add>, %40, %cst_23 [1] : vector<96x48xf32> to vector<96xf32>
    %42 = vector.shape_cast %41 : vector<96xf32> to vector<96x1xf32>
    %cst_24 = arith.constant 4.800000e+01 : f32
    %43 = vector.broadcast %cst_24 : f32 to vector<96x1xf32>
    %44 = arith.divf %42, %43 : vector<96x1xf32>
    %cst_25 = arith.constant 9.99999974E-6 : f32
    %45 = vector.broadcast %cst_25 : f32 to vector<96x1xf32>
    %46 = arith.addf %44, %45 : vector<96x1xf32>
    %47 = math.rsqrt %46 : vector<96x1xf32>
    %48 = vector.broadcast %47 : vector<96x1xf32> to vector<96x48xf32>
    %49 = arith.mulf %39, %48 : vector<96x48xf32>
    %50 = vector.broadcast %32 : vector<1x48xf32> to vector<96x48xf32>
    %51 = arith.mulf %49, %50 : vector<96x48xf32>
    %52 = vector.broadcast %33 : vector<1x48xf32> to vector<96x48xf32>
    %53 = arith.addf %51, %52 : vector<96x48xf32>
    %c0_26 = arith.constant 0 : index
    %c0_27 = arith.constant 0 : index
    %54 = vector.load %arg7[%c0_26, %c0_27] : memref<96x48xf32, #tpu.memory_space<vmem>>, vector<96x48xf32>
    tpu.vector_store %arg7[%c0_26, %c0_27], %53 {strides = array<i32>} : memref<96x48xf32, #tpu.memory_space<vmem>>, vector<96x48xf32>,
    return
  }
  func.func @transform_0(%arg0: i32) -> (i32, i32) {
    %c0_i32 = arith.constant 0 : i32
    %c0_i32_0 = arith.constant 0 : i32
    return %arg0, %c0_i32 : i32, i32
  }
  func.func @transform_1(%arg0: i32) -> (i32, i32) {
    %c0_i32 = arith.constant 0 : i32
    %c0_i32_0 = arith.constant 0 : i32
    %c0_i32_1 = arith.constant 0 : i32
    return %c0_i32, %c0_i32_0 : i32, i32
  }
  func.func @transform_2(%arg0: i32) -> (i32, i32) {
    %c0_i32 = arith.constant 0 : i32
    %c0_i32_0 = arith.constant 0 : i32
    %c0_i32_1 = arith.constant 0 : i32
    return %c0_i32, %c0_i32_0 : i32, i32
  }
  func.func @transform_3(%arg0: i32) -> (i32, i32) {
    %c0_i32 = arith.constant 0 : i32
    %c0_i32_0 = arith.constant 0 : i32
    %c0_i32_1 = arith.constant 0 : i32
    return %c0_i32, %c0_i32_0 : i32, i32
  }
  func.func @transform_4(%arg0: i32) -> (i32, i32) {
    %c0_i32 = arith.constant 0 : i32
    %c0_i32_0 = arith.constant 0 : i32
    %c0_i32_1 = arith.constant 0 : i32
    return %c0_i32, %c0_i32_0 : i32, i32
  }
  func.func @transform_5(%arg0: i32) -> (i32, i32) {
    %c0_i32 = arith.constant 0 : i32
    %c0_i32_0 = arith.constant 0 : i32
    return %arg0, %c0_i32 : i32, i32
  }
  func.func @transform_6(%arg0: i32) -> (i32, i32) {
    %c0_i32 = arith.constant 0 : i32
    %c0_i32_0 = arith.constant 0 : i32
    return %arg0, %c0_i32 : i32, i32
  }
}

</mosaic_0001>

<bundles_post_ra>
// kernel: tpu_custom_call.1
= control target key start
LH: loop header
LB: loop body
LE: loop exit
PB: predicated region body
PF: predicated region fallthrough
CT: control target
= control target key end

     0   :  { %s1298_s21 = smov 0   ;;  %s1675_s0 = inlined_call_operand.vmem [shape: f32[192,48], index: 0, kind: input, shape index: {}]   ;;  %s1676_s1 = inlined_call_operand.vmem [shape: bf16[48,64], index: 1, kind: input, shape index: {}]   ;;  %s1677_s2 = inlined_call_operand.vmem [shape: f32[1,64], index: 2, kind: input, shape index: {}]   ;;  %s1678_s3 = inlined_call_operand.vmem [shape: bf16[64,48], index: 3, kind: input, shape index: {}]   ;;  %s1679_s4 = inlined_call_operand.vmem [shape: f32[3,48], index: 4, kind: input, shape index: {}]   ;;  %s1680_s5 = inlined_call_operand.vmem [shape: bf16[192,64], index: 5, kind: output, shape index: {0}]   ;;  %s1681_s6 = inlined_call_operand.vmem [shape: f32[192,48], index: 6, kind: output, shape index: {1}]  }
   0x1 LB: > { %s1042_s22 = sadd.s32 4294967295, %s1261_s21   ;;  %p1046_p0 = scmp.ge.s32.totalorder %s1261_s21, 1  ;;  %s1261_s21 = sphi %s1298_s21, %s17_s21  }
   0x2   : > { %p216_p1 = scmp.lt.s32.totalorder %s1261_s21, 3 }
   0x4   : > { %p217_p2 = pnand %p1046_p0, %p216_p1 }
   0x5   : > { %s251_s25 = smul.u32 (!%p217_p2), 12, %s1042_s22 }
   0x6   : > { %220 = sbr.rel (%p217_p2) target bundleno = 801 (0x321), region = 40 }
   0x7   : > { %p252_p3 = scmp.lt.s32.totalorder (!%p217_p2), %s251_s25, 23 }
   0xb   : > { %v1176_v0 = vld [vmem:[%s1676_s1 + $0x10] sm:$0xff]   ;;  %v1177_v1 = vld [vmem:[%s1676_s1 + $0x8] sm:$0xff]   ;;  %v1179_v2 = vld [vmem:[%s1678_s3 + $0x18] sm:$0xff]   ;;  %s1683_s25 = smov (!%p252_p3, %s251_s25), 23  ;;  %vm319_vm0 = vcmask 392192   ;;  %vm467_vm1 = vcmask 519168  }
   0xc   : > { %1130 = vmatprep.subr.bf16.mxu0 %v1176_v0  ;;  %v1178_v3 = vld [vmem:[%s1676_s1] sm:$0xff]   ;;  %1148 = vmatprep.subr.bf16.mxu1 %v1179_v2  ;;  %s1047_s8 = sshll.u32 %s1683_s25, 3  ;;  %v1180_v22 = vld [vmem:[%s1678_s3 + $0x10] sm:$0xff]   ;;  %v1181_v23 = vld [vmem:[%s1678_s3 + $0x8] sm:$0xff]   ;;  %s1048_s20 = sshll.u32 %s1683_s25, 2  ;;  %vm517_vm2 = vcmask 523264  }
   0xd   : > { %1131 = vmatpush3.bf16.msra.mxu0 %v1176_v0  ;;  %1149 = vmatpush3.bf16.msra.mxu1 %v1179_v2  ;;  %s255_s11 = scalar_lea.vmem %s1675_s0, %s1047_s8  ;;  %v1182_v24 = vld [vmem:[%s1678_s3] sm:$0xff]   ;;  %s1384_s24 = scalar_lea.vmem %s1680_s5, %s1048_s20 }
   0xe   : > { %1132 = vmatprep.subr.bf16.mxu0 %v1177_v1  ;;  %v1326_v4 = vld [vmem:[%s255_s11] sm:$0xff]  ;;  %v1328_v5 = vld [vmem:[%s255_s11 + $0x8] sm:$0xff]  ;;  %v1330_v6 = vld [vmem:[%s255_s11 + $0x10] sm:$0xff]  ;;  %1150 = vmatprep.subr.bf16.mxu1 %v1180_v22 }
   0xf   : > { %v282_v7 = vpack.c.bf16 %v1328_v5, %v1326_v4  ;;  %v1334_v8 = vld [vmem:[%s255_s11 + $0x18] sm:$0xff]  ;;  %v1336_v9 = vld [vmem:[%s255_s11 + $0x20] sm:$0xff]  ;;  %v1338_v10 = vld [vmem:[%s255_s11 + $0x28] sm:$0xff] }
  0x10   : > { %v283_v11 = vpack.c.bf16 %v1334_v8, %v1330_v6  ;;  %v284_v12 = vpack.c.bf16 %v1338_v10, %v1336_v9  ;;  %v1347_v13 = vld [vmem:[%s255_s11 + $0x30] sm:$0xff]  ;;  %v1349_v14 = vld [vmem:[%s255_s11 + $0x38] sm:$0xff]  ;;  %v1351_v15 = vld [vmem:[%s255_s11 + $0x40] sm:$0xff] }
  0x11   : > { %1133 = vmatpush3.bf16.msra.mxu0 %v1177_v1  ;;  %1136 = vmatprep.mubr.msk.bf16.mxu0 %vm319_vm0, %v282_v7  ;;  %v1353_v16 = vld [vmem:[%s255_s11 + $0x48] sm:$0xff]  ;;  %v285_v17 = vpack.c.bf16 %v1349_v14, %v1347_v13  ;;  %v1361_v19 = vld [vmem:[%s255_s11 + $0x50] sm:$0xff]  ;;  %v1363_v20 = vld [vmem:[%s255_s11 + $0x58] sm:$0xff]  ;;  %s1612_s11 = scalar_lea.vmem %s1681_s6, %s1047_s8 }
  0x12   : > { %1134 = vmatprep.subr.bf16.mxu0 %v1178_v3  ;;  %v286_v18 = vpack.c.bf16 %v1353_v16, %v1351_v15  ;;  %v287_v21 = vpack.c.bf16 %v1363_v20, %v1361_v19  ;;  %1151 = vmatpush3.bf16.msra.mxu1 %v1180_v22  ;;  %v1050_v25 = vld [vmem:[%s1677_s2] ss:$0 sm:$0xff] }
  0x13   : > { %1152 = vmatprep.subr.bf16.mxu1 %v1181_v23  ;;  %v1072_v7 = vld [vmem:[%s1679_s4] ss:$0 sm:$0xff] }
  0x15   : > { %1135 = vmatpush3.bf16.msra.mxu0 %v1178_v3 }
  0x16   : > { %1153 = vmatpush3.bf16.msra.mxu1 %v1181_v23 }
  0x17   : > { %1154 = vmatprep.subr.bf16.mxu1 %v1182_v24 }
  0x18   : > { %1137 = vmatmul.mubr.msk.bf16.vlgmr.msra.gmra.mxu0 %vm319_vm0, %v283_v11 }
  0x19   : > { %1140 = vmatprep.mubr.msk.bf16.mxu0 %vm319_vm0, %v284_v12 }
  0x1a   : > { %1155 = vmatpush3.bf16.msra.mxu1 %v1182_v24 }
  0x20   : > { %1141 = vmatmul.mubr.msk.bf16.gmra.mxu0 %vm319_vm0, %v285_v17 }
  0x21   : > { %1144 = vmatprep.mubr.msk.bf16.mxu0 %vm319_vm0, %v286_v18 }
  0x28   : > { %1145 = vmatmul.mubr.msk.bf16.gmra.mxu0 %vm319_vm0, %v287_v21 }
  0xd8   : > { %v1138_v26 = vpop.f32.mrf.mxu0 }
  0xd9   : > { %v381_v27 = vadd.f32 %v1138_v26, %v1050_v25 }
  0xda   : > { %v372_v28 = vpop.f32.mrf.mxu0 }
  0xdb   : > { %v1101_v29 = vpack.c.bf16 %v381_v27, %v381_v27  ;;  %v373_v30 = vadd.f32 %v1050_v25, %v372_v28 }
  0xdc   : > { %v1139_v31 = vpop.f32.mrf.mxu0 }
  0xdd   : > { %470 = vst.msk [vmem:[%s1384_s24 + $0x8] sm:$0xf] %vm467_vm1, %v1101_v29  ;;  %v1099_v32 = vpack.c.bf16 %v373_v30, %v373_v30  ;;  %v384_v33 = vadd.f32 %v1139_v31, %v1050_v25 }
  0xde   : > { %v375_v34 = vpop.f32.mrf.mxu0 }
  0xdf   : > { %468 = vst.msk [vmem:[%s1384_s24] sm:$0xf] %vm467_vm1, %v1099_v32  ;;  %v1102_v35 = vpack.c.bf16 %v384_v33, %v384_v33  ;;  %v376_v36 = vadd.f32 %v1050_v25, %v375_v34  ;;  %v420_v41 = vpack.c.bf16 %v384_v33, %v381_v27 }
  0xe0   : > { %v1142_v37 = vpop.f32.mrf.mxu0 }
  0xe1   : > { %471 = vst.msk [vmem:[%s1384_s24 + $0xc] sm:$0xf] %vm467_vm1, %v1102_v35  ;;  %v1100_v38 = vpack.c.bf16 %v376_v36, %v376_v36  ;;  %v397_v39 = vadd.f32 %v1142_v37, %v1050_v25  ;;  %v419_v40 = vpack.c.bf16 %v376_v36, %v373_v30 }
  0xe2   : > { %v388_v42 = vpop.f32.mrf.mxu0 }
  0xe3   : > { %469 = vst.msk [vmem:[%s1384_s24 + $0x4] sm:$0xf] %vm467_vm1, %v1100_v38  ;;  %v1105_v43 = vpack.c.bf16 %v397_v39, %v397_v39  ;;  %v389_v44 = vadd.f32 %v1050_v25, %v388_v42  ;;  %1156 = vmatprep.mubr.msk.bf16.mxu1 %vm517_vm2, %v419_v40 }
  0xe4   : > { %v1143_v45 = vpop.f32.mrf.mxu0  ;;  %1157 = vmatmul.mubr.msk.bf16.vlgmr.msra.gmra.mxu1 %vm517_vm2, %v420_v41 }
  0xe5   : > { %474 = vst.msk [vmem:[%s1384_s24 + $0x18] sm:$0xf] %vm467_vm1, %v1105_v43  ;;  %v1103_v46 = vpack.c.bf16 %v389_v44, %v389_v44  ;;  %v400_v47 = vadd.f32 %v1143_v45, %v1050_v25 }
  0xe6   : > { %v391_v48 = vpop.f32.mrf.mxu0 }
  0xe7   : > { %472 = vst.msk [vmem:[%s1384_s24 + $0x10] sm:$0xf] %vm467_vm1, %v1103_v46  ;;  %v1106_v49 = vpack.c.bf16 %v400_v47, %v400_v47  ;;  %v392_v50 = vadd.f32 %v1050_v25, %v391_v48  ;;  %v422_v55 = vpack.c.bf16 %v400_v47, %v397_v39 }
  0xe8   : > { %v1146_v51 = vpop.f32.mrf.mxu0 }
  0xe9   : > { %475 = vst.msk [vmem:[%s1384_s24 + $0x1c] sm:$0xf] %vm467_vm1, %v1106_v49  ;;  %v421_v52 = vpack.c.bf16 %v392_v50, %v389_v44  ;;  %v1104_v53 = vpack.c.bf16 %v392_v50, %v392_v50  ;;  %v413_v54 = vadd.f32 %v1146_v51, %v1050_v25 }
  0xea   : > { %v404_v56 = vpop.f32.mrf.mxu0 }
  0xeb   : > { %473 = vst.msk [vmem:[%s1384_s24 + $0x14] sm:$0xf] %vm467_vm1, %v1104_v53  ;;  %v1109_v57 = vpack.c.bf16 %v413_v54, %v413_v54  ;;  %v405_v58 = vadd.f32 %v1050_v25, %v404_v56  ;;  %1160 = vmatprep.mubr.msk.bf16.mxu1 %vm517_vm2, %v421_v52 }
  0xec   : > { %v1147_v59 = vpop.f32.mrf.mxu0  ;;  %1161 = vmatmul.mubr.msk.bf16.gmra.mxu1 %vm517_vm2, %v422_v55 }
  0xed   : > { %478 = vst.msk [vmem:[%s1384_s24 + $0x28] sm:$0xf] %vm467_vm1, %v1109_v57  ;;  %v1107_v60 = vpack.c.bf16 %v405_v58, %v405_v58  ;;  %v416_v61 = vadd.f32 %v1147_v59, %v1050_v25 }
  0xee   : > { %v407_v62 = vpop.f32.mrf.mxu0 }
  0xef   : > { %476 = vst.msk [vmem:[%s1384_s24 + $0x20] sm:$0xf] %vm467_vm1, %v1107_v60  ;;  %v1110_v63 = vpack.c.bf16 %v416_v61, %v416_v61  ;;  %v408_v0 = vadd.f32 %v1050_v25, %v407_v62  ;;  %v424_v3 = vpack.c.bf16 %v416_v61, %v413_v54 }
  0xf1   : > { %479 = vst.msk [vmem:[%s1384_s24 + $0x2c] sm:$0xf] %vm467_vm1, %v1110_v63  ;;  %v423_v1 = vpack.c.bf16 %v408_v0, %v405_v58  ;;  %v1108_v2 = vpack.c.bf16 %v408_v0, %v408_v0 }
  0xf3   : > { %477 = vst.msk [vmem:[%s1384_s24 + $0x24] sm:$0xf] %vm467_vm1, %v1108_v2  ;;  %1164 = vmatprep.mubr.msk.bf16.mxu1 %vm517_vm2, %v423_v1 }
  0xf4   : > { %1165 = vmatmul.mubr.msk.bf16.gmra.mxu1 %vm517_vm2, %v424_v3 }
 0x1a4   : > { %v1158_v11 = vpop.f32.mrf.mxu1 }
 0x1a5   : > { %v1419_v12 = vadd.f32 %v1158_v11, %v1072_v7 }
 0x1a6   : > { %v570_v17 = vpop.f32.mrf.mxu1 }
 0x1a7   : > { %v619_v18 = vmin.f32 %v1419_v12, 20.0  ;;  %v1422_v21 = vadd.f32 %v1072_v7, %v570_v17 }
 0x1a8   : > { %v1159_v22 = vpop.f32.mrf.mxu1 }
 0x1a9   : > { %v633_v23 = vmul.f32 1.442695, %v619_v18  ;;  %v617_v24 = vmin.f32 %v1422_v21, 20.0  ;;  %v1425_v25 = vadd.f32 %v1159_v22, %v1072_v7 }
 0x1aa   : > { %v573_v26 = vpop.f32.mrf.mxu1 }
 0x1ab   : > { %1183 = vpow2.f32 %v633_v23  ;;  %v629_v27 = vmul.f32 1.442695, %v617_v24  ;;  %v620_v28 = vmin.f32 %v1425_v25, 20.0  ;;  %v1428_v29 = vadd.f32 %v1072_v7, %v573_v26 }
 0x1ac   : > { %v1162_v30 = vpop.f32.mrf.mxu1 }
 0x1ad   : > { %1185 = vpow2.f32 %v629_v27  ;;  %v635_v31 = vmul.f32 1.442695, %v620_v28  ;;  %v618_v32 = vmin.f32 %v1428_v29, 20.0  ;;  %v1431_v33 = vadd.f32 %v1162_v30, %v1072_v7 }
 0x1ae   : > { %v586_v34 = vpop.f32.mrf.mxu1 }
 0x1af   : > { %1187 = vpow2.f32 %v635_v31  ;;  %v631_v35 = vmul.f32 1.442695, %v618_v32  ;;  %v623_v36 = vmin.f32 %v1431_v33, 20.0  ;;  %v1434_v37 = vadd.f32 %v1072_v7, %v586_v34 }
 0x1b0   : > { %v1163_v38 = vpop.f32.mrf.mxu1 }
 0x1b1   : > { %1189 = vpow2.f32 %v631_v35  ;;  %v641_v39 = vmul.f32 1.442695, %v623_v36  ;;  %v621_v40 = vmin.f32 %v1434_v37, 20.0  ;;  %v1437_v41 = vadd.f32 %v1163_v38, %v1072_v7 }
 0x1b2   : > { %v589_v42 = vpop.f32.mrf.mxu1 }
 0x1b3   : > { %1191 = vpow2.f32 %v641_v39  ;;  %v637_v43 = vmul.f32 1.442695, %v621_v40  ;;  %v624_v44 = vmin.f32 %v1437_v41, 20.0  ;;  %v1440_v45 = vadd.f32 %v1072_v7, %v589_v42 }
 0x1b4   : > { %v1166_v46 = vpop.f32.mrf.mxu1 }
 0x1b5   : > { %1193 = vpow2.f32 %v637_v43  ;;  %v643_v47 = vmul.f32 1.442695, %v624_v44  ;;  %v622_v48 = vmin.f32 %v1440_v45, 20.0  ;;  %v1443_v49 = vadd.f32 %v1166_v46, %v1072_v7 }
 0x1b6   : > { %v602_v50 = vpop.f32.mrf.mxu1 }
 0x1b7   : > { %1195 = vpow2.f32 %v643_v47  ;;  %v639_v51 = vmul.f32 1.442695, %v622_v48  ;;  %v627_v52 = vmin.f32 %v1443_v49, 20.0  ;;  %v1446_v53 = vadd.f32 %v1072_v7, %v602_v50 }
 0x1b8   : > { %v1184_v54 = vpop.eup %1183  ;;  %v1167_v55 = vpop.f32.mrf.mxu1 }
 0x1b9   : > { %v655_v56 = vadd.f32 1.0, %v1184_v54  ;;  %1197 = vpow2.f32 %v639_v51  ;;  %v649_v57 = vmul.f32 1.442695, %v627_v52  ;;  %v625_v58 = vmin.f32 %v1446_v53, 20.0 }
 0x1ba   : > { %v1186_v59 = vpop.eup %1185  ;;  %v1449_v60 = vadd.f32 %v1167_v55, %v1072_v7  ;;  %v605_v61 = vpop.f32.mrf.mxu1 }
 0x1bb   : > { %v667_v62 = vmul.f32 %v655_v56, %v655_v56  ;;  %v653_v63 = vadd.f32 1.0, %v1186_v59  ;;  %1199 = vpow2.f32 %v649_v57  ;;  %v645_v0 = vmul.f32 1.442695, %v625_v58 }
 0x1bc   : > { %v1188_v1 = vpop.eup %1187  ;;  %v628_v2 = vmin.f32 %v1449_v60, 20.0  ;;  %v1452_v3 = vadd.f32 %v1072_v7, %v605_v61 }
 0x1bd   : > { %v703_v11 = vadd.f32 1.0, %v667_v62  ;;  %v665_v17 = vmul.f32 %v653_v63, %v653_v63  ;;  %v656_v18 = vadd.f32 1.0, %v1188_v1  ;;  %1201 = vpow2.f32 %v645_v0 }
 0x1be   : > { %v1190_v22 = vpop.eup %1189  ;;  %v651_v23 = vmul.f32 1.442695, %v628_v2  ;;  %v626_v24 = vmin.f32 %v1452_v3, 20.0  ;;  %v1085_v47 = vadd.f32 -1.0, %v667_v62 }
 0x1bf   : > { %1203 = vrcp.f32 %v703_v11  ;;  %v701_v26 = vadd.f32 1.0, %v665_v17  ;;  %v668_v28 = vmul.f32 %v656_v18, %v656_v18  ;;  %v654_v30 = vadd.f32 1.0, %v1190_v22 }
 0x1c0   : > { %v1192_v27 = vpop.eup %1191  ;;  %1205 = vpow2.f32 %v651_v23  ;;  %v647_v31 = vmul.f32 1.442695, %v626_v24  ;;  %v1083_v55 = vadd.f32 -1.0, %v665_v17  ;;  %v691_v59 = vmul.f32 %v1085_v47, %v1419_v12 }
 0x1c1   : > { %1207 = vrcp.f32 %v701_v26  ;;  %v659_v32 = vadd.f32 1.0, %v1192_v27  ;;  %v704_v7 = vadd.f32 1.0, %v668_v28  ;;  %v666_v35 = vmul.f32 %v654_v30, %v654_v30 }
 0x1c2   : > { %v1194_v34 = vpop.eup %1193  ;;  %1209 = vpow2.f32 %v647_v31  ;;  %v1086_v2 = vadd.f32 -1.0, %v668_v28  ;;  %v689_v23 = vmul.f32 %v1083_v55, %v1422_v21 }
 0x1c3   : > { %v671_v36 = vmul.f32 %v659_v32, %v659_v32  ;;  %v657_v38 = vadd.f32 1.0, %v1194_v34  ;;  %1211 = vrcp.f32 %v704_v7  ;;  %v702_v40 = vadd.f32 1.0, %v666_v35 }
 0x1c4   : > { %v1196_v39 = vpop.eup %1195  ;;  %v1084_v24 = vadd.f32 -1.0, %v666_v35  ;;  %v692_v28 = vmul.f32 %v1086_v2, %v1425_v25 }
 0x1c5   : > { %v707_v42 = vadd.f32 1.0, %v671_v36  ;;  %v669_v43 = vmul.f32 %v657_v38, %v657_v38  ;;  %v660_v44 = vadd.f32 1.0, %v1196_v39  ;;  %1213 = vrcp.f32 %v702_v40 }
 0x1c6   : > { %v1198_v46 = vpop.eup %1197  ;;  %v1089_v27 = vadd.f32 -1.0, %v671_v36  ;;  %v690_v35 = vmul.f32 %v1084_v24, %v1428_v29 }
 0x1c7   : > { %1215 = vrcp.f32 %v707_v42  ;;  %v705_v48 = vadd.f32 1.0, %v669_v43  ;;  %v672_v51 = vmul.f32 %v660_v44, %v660_v44  ;;  %v658_v52 = vadd.f32 1.0, %v1198_v46 }
 0x1c8   : > { %v1200_v50 = vpop.eup %1199  ;;  %v695_v42 = vmul.f32 %v1089_v27, %v1431_v33  ;;  %v1087_v44 = vadd.f32 -1.0, %v669_v43 }
 0x1c9   : > { %1217 = vrcp.f32 %v705_v48  ;;  %v663_v54 = vadd.f32 1.0, %v1200_v50  ;;  %v708_v56 = vadd.f32 1.0, %v672_v51  ;;  %v670_v57 = vmul.f32 %v658_v52, %v658_v52 }
 0x1ca   : > { %v1202_v58 = vpop.eup %1201  ;;  %v1090_v47 = vadd.f32 -1.0, %v672_v51  ;;  %v693_v33 = vmul.f32 %v1087_v44, %v1434_v37 }
 0x1cb   : > { %v675_v61 = vmul.f32 %v663_v54, %v663_v54  ;;  %1219 = vrcp.f32 %v708_v56  ;;  %v706_v0 = vadd.f32 1.0, %v670_v57  ;;  %v661_v11 = vadd.f32 1.0, %v1202_v58 }
 0x1cc   : > { %v1204_v63 = vpop.eup %1203  ;;  %v1088_v55 = vadd.f32 -1.0, %v670_v57  ;;  %v696_v56 = vmul.f32 %v1090_v47, %v1437_v41 }
 0x1cd   : > { %v1206_v1 = vpop.eup %1205  ;;  %v711_v62 = vadd.f32 1.0, %v675_v61  ;;  %v727_v18 = vmul.f32 %v1204_v63, %v691_v59  ;;  %1221 = vrcp.f32 %v706_v0  ;;  %v673_v30 = vmul.f32 %v661_v11, %v661_v11 }
 0x1ce   : > { %v1208_v22 = vpop.eup %1207  ;;  %v664_v17 = vadd.f32 1.0, %v1206_v1  ;;  %v694_v63 = vmul.f32 %v1088_v55, %v1440_v45  ;;  %v1093_v1 = vadd.f32 -1.0, %v675_v61 }
 0x1cf   : > { %v1210_v26 = vpop.eup %1209  ;;  %v1458_v12 = vadd.f32 %v727_v18, %v1330_v6  ;;  %v725_v34 = vmul.f32 %v1208_v22, %v689_v23  ;;  %1223 = vrcp.f32 %v711_v62  ;;  %v709_v38 = vadd.f32 1.0, %v673_v30 }
 0x1d0   : > { %v676_v31 = vmul.f32 %v664_v17, %v664_v17  ;;  %v662_v32 = vadd.f32 1.0, %v1210_v26  ;;  %v1212_v7 = vpop.eup %1211  ;;  %v1091_v2 = vadd.f32 -1.0, %v673_v30 }
 0x1d1   : > { %v757_v21 = vsel %vm319_vm0, %v1458_v12, 0.0  ;;  %v1465_v36 = vadd.f32 %v725_v34, %v1326_v4  ;;  %1225 = vrcp.f32 %v709_v38  ;;  %v728_v46 = vmul.f32 %v1212_v7, %v692_v28 }
 0x1d2   : > { %v712_v39 = vadd.f32 1.0, %v676_v31  ;;  %v674_v40 = vmul.f32 %v662_v32, %v662_v32  ;;  %758 = vadd.xlane.f32.xlu1 %v757_v21  ;;  %v1214_v6 = vpop.eup %1213  ;;  %v1094_v18 = vadd.f32 -1.0, %v676_v31  ;;  %v697_v23 = vmul.f32 %v1091_v2, %v1446_v53 }
 0x1d3   : > { %v751_v50 = vsel %vm319_vm0, %v1465_v36, 0.0  ;;  %v1471_v29 = vadd.f32 %v728_v46, %v1334_v8  ;;  %v726_v52 = vmul.f32 %v1214_v6, %v690_v35 }
 0x1d4   : > { %v1216_v25 = vpop.eup %1215  ;;  %1227 = vrcp.f32 %v712_v39  ;;  %v710_v48 = vadd.f32 1.0, %v674_v40  ;;  %752 = vadd.xlane.f32.xlu0 %v751_v50  ;;  %v1092_v22 = vadd.f32 -1.0, %v674_v40  ;;  %v700_v30 = vmul.f32 %v1094_v18, %v1449_v60 }
 0x1d5   : > { %v731_v54 = vmul.f32 %v1216_v25, %v695_v42  ;;  %v760_v43 = vsel %vm319_vm0, %v1471_v29, 0.0  ;;  %v1477_v51 = vadd.f32 %v726_v52, %v1328_v5 }
 0x1d6   : > { %v1218_v4 = vpop.eup %1217  ;;  %1229 = vrcp.f32 %v710_v48  ;;  %761 = vadd.xlane.f32.xlu1 %v760_v43  ;;  %v698_v31 = vmul.f32 %v1092_v22, %v1452_v3 }
 0x1d7   : > { %v754_v8 = vsel %vm319_vm0, %v1477_v51, 0.0  ;;  %v1483_v59 = vadd.f32 %v731_v54, %v1347_v13  ;;  %v729_v57 = vmul.f32 %v1218_v4, %v693_v33 }
 0x1d8   : > { %v1220_v58 = vpop.eup %1219  ;;  %755 = vadd.xlane.f32.xlu0 %v754_v8 }
 0x1d9   : > { %v732_v37 = vmul.f32 %v1220_v58, %v696_v56  ;;  %v769_v62 = vsel %vm319_vm0, %v1483_v59, 0.0  ;;  %v1492_v11 = vadd.f32 %v729_v57, %v1336_v9 }
 0x1da   : > { %v1222_v0 = vpop.eup %1221 }
 0x1db   : > { %v1487_v5 = vadd.f32 %v732_v37, %v1349_v14  ;;  %v730_v41 = vmul.f32 %v1222_v0, %v694_v63  ;;  %v699_v14 = vmul.f32 %v1093_v1, %v1443_v49  ;;  %v763_v9 = vsel %vm319_vm0, %v1492_v11, 0.0 }
 0x1dc   : > { %v1224_v13 = vpop.eup %1223  ;;  %770 = vadd.xlane.f32.xlu0 %v769_v62 }
 0x1dd   : > { %v772_v45 = vsel %vm319_vm0, %v1487_v5, 0.0  ;;  %v1497_v61 = vadd.f32 %v730_v41, %v1338_v10  ;;  %v735_v27 = vmul.f32 %v1224_v13, %v699_v14 }
 0x1de   : > { %773 = vadd.xlane.f32.xlu1 %v772_v45  ;;  %v1226_v24 = vpop.eup %1225 }
 0x1df   : > { %v733_v26 = vmul.f32 %v1226_v24, %v697_v23  ;;  %v766_v10 = vsel %vm319_vm0, %v1497_v61, 0.0  ;;  %v1510_v28 = vadd.f32 %v735_v27, %v1361_v19 }
 0x1e0   : > { %764 = vadd.xlane.f32.xlu0 %v763_v9 }
 0x1e1   : > { %v1228_v17 = vpop.eup %1227  ;;  %v745_v49 = vadd.f32 %v733_v26, %v1351_v15  ;;  %v781_v15 = vsel %vm319_vm0, %v1510_v28, 0.0 }
 0x1e2   : > { %767 = vadd.xlane.f32.xlu1 %v766_v10  ;;  %v736_v34 = vmul.f32 %v1228_v17, %v700_v30 }
 0x1e3   : > { %v1230_v32 = vpop.eup %1229  ;;  %v775_v7 = vsel %vm319_vm0, %v745_v49, 0.0 }
 0x1e4   : > { %v734_v53 = vmul.f32 %v1230_v32, %v698_v31  ;;  %776 = vadd.xlane.f32.xlu0 %v775_v7  ;;  %v1518_v38 = vadd.f32 %v736_v34, %v1363_v20 }
 0x1e6   : > { %v1513_v60 = vadd.f32 %v734_v53, %v1353_v16  ;;  %v784_v21 = vsel %vm319_vm0, %v1518_v38, 0.0 }
 0x1e8   : > { %v778_v3 = vsel %vm319_vm0, %v1513_v60, 0.0  ;;  %782 = vadd.xlane.f32.xlu0 %v781_v15 }
 0x1e9   : > { %779 = vadd.xlane.f32.xlu1 %v778_v3 }
 0x1ed   : > { %785 = vadd.xlane.f32.xlu1 %v784_v21 }
 0x25b   : > { %v759_v19 = vpop.xlane.xlu1 %758 }
 0x25c   : > { %v790_v35 = vmul.f32 0.020833334, %v759_v19 }
 0x25d   : > { %v753_v39 = vpop.xlane.xlu0 %752 }
 0x25e   : > { %v1525_v16 = vsub.f32 %v1458_v12, %v790_v35  ;;  %v788_v40 = vmul.f32 0.020833334, %v753_v39 }
 0x25f   : > { %v762_v6 = vpop.xlane.xlu1 %761 }
 0x260   : > { %v814_v20 = vmul.f32 %v1525_v16, %v1525_v16  ;;  %v1530_v42 = vsub.f32 %v1465_v36, %v788_v40  ;;  %v791_v44 = vmul.f32 0.020833334, %v762_v6 }
 0x261   : > { %v756_v25 = vpop.xlane.xlu0 %755 }
 0x262   : > { %v830_v46 = vsel %vm319_vm0, %v814_v20, 0.0  ;;  %v1534_v47 = vsub.f32 %v1471_v29, %v791_v44  ;;  %v789_v48 = vmul.f32 0.020833334, %v756_v25  ;;  %v812_v12 = vmul.f32 %v1530_v42, %v1530_v42 }
 0x263   : > { %831 = vadd.xlane.f32.xlu0 %v830_v46 }
 0x264   : > { %v1539_v50 = vsub.f32 %v1477_v51, %v789_v48  ;;  %v815_v52 = vmul.f32 %v1534_v47, %v1534_v47  ;;  %v824_v36 = vsel %vm319_vm0, %v812_v12, 0.0 }
 0x265   : > { %v771_v54 = vpop.xlane.xlu0 %770 }
 0x266   : > { %v794_v4 = vmul.f32 0.020833334, %v771_v54  ;;  %v833_v33 = vsel %vm319_vm0, %v815_v52, 0.0  ;;  %v813_v29 = vmul.f32 %v1539_v50, %v1539_v50 }
 0x267   : > { %825 = vadd.xlane.f32.xlu0 %v824_v36  ;;  %v774_v55 = vpop.xlane.xlu1 %773  ;;  %834 = vadd.xlane.f32.xlu1 %v833_v33 }
 0x268   : > { %v795_v43 = vmul.f32 0.020833334, %v774_v55  ;;  %v1548_v56 = vsub.f32 %v1483_v59, %v794_v4  ;;  %v827_v63 = vsel %vm319_vm0, %v813_v29, 0.0  ;;  %v1598_v29 = vld [vmem:[%s1679_s4 + $0x1] ss:$0 sm:$0xff] }
 0x269   : > { %v765_v58 = vpop.xlane.xlu0 %764 }
 0x26a   : > { %v1551_v51 = vsub.f32 %v1487_v5, %v795_v43  ;;  %v792_v8 = vmul.f32 0.020833334, %v765_v58  ;;  %v818_v37 = vmul.f32 %v1548_v56, %v1548_v56 }
 0x26b   : > { %v768_v57 = vpop.xlane.xlu1 %767  ;;  %828 = vadd.xlane.f32.xlu1 %v827_v63  ;;  %v1604_v63 = vld [vmem:[%s1679_s4 + $0x2] ss:$0 sm:$0xff] }
 0x26c   : > { %v793_v0 = vmul.f32 0.020833334, %v768_v57  ;;  %v819_v1 = vmul.f32 %v1551_v51, %v1551_v51  ;;  %v1559_v2 = vsub.f32 %v1492_v11, %v792_v8  ;;  %v842_v59 = vsel %vm319_vm0, %v818_v37, 0.0 }
 0x26d   : > { %843 = vadd.xlane.f32.xlu0 %v842_v59  ;;  %v777_v41 = vpop.xlane.xlu0 %776 }
 0x26e   : > { %v1563_v5 = vsub.f32 %v1497_v61, %v793_v0  ;;  %v845_v62 = vsel %vm319_vm0, %v819_v1, 0.0  ;;  %v796_v13 = vmul.f32 0.020833334, %v777_v41  ;;  %v816_v18 = vmul.f32 %v1559_v2, %v1559_v2 }
 0x26f   : > { %846 = vadd.xlane.f32.xlu1 %v845_v62 }
 0x270   : > { %v817_v22 = vmul.f32 %v1563_v5, %v1563_v5  ;;  %v1570_v45 = vsub.f32 %v745_v49, %v796_v13  ;;  %v836_v14 = vsel %vm319_vm0, %v816_v18, 0.0 }
 0x271   : > { %837 = vadd.xlane.f32.xlu0 %v836_v14  ;;  %v783_v61 = vpop.xlane.xlu0 %782 }
 0x272   : > { %v780_v11 = vpop.xlane.xlu1 %779  ;;  %v839_v24 = vsel %vm319_vm0, %v817_v22, 0.0  ;;  %v798_v17 = vmul.f32 0.020833334, %v783_v61  ;;  %v820_v9 = vmul.f32 %v1570_v45, %v1570_v45 }
 0x273   : > { %v797_v23 = vmul.f32 0.020833334, %v780_v11  ;;  %840 = vadd.xlane.f32.xlu1 %v839_v24 }
 0x274   : > { %v1580_v27 = vsub.f32 %v1510_v28, %v798_v17  ;;  %v848_v31 = vsel %vm319_vm0, %v820_v9, 0.0 }
 0x275   : > { %v1577_v26 = vsub.f32 %v1513_v60, %v797_v23  ;;  %849 = vadd.xlane.f32.xlu0 %v848_v31 }
 0x276   : > { %v786_v30 = vpop.xlane.xlu1 %785  ;;  %v822_v49 = vmul.f32 %v1580_v27, %v1580_v27 }
 0x277   : > { %v799_v10 = vmul.f32 0.020833334, %v786_v30  ;;  %v821_v32 = vmul.f32 %v1577_v26, %v1577_v26 }
 0x278   : > { %v854_v7 = vsel %vm319_vm0, %v822_v49, 0.0 }
 0x279   : > { %v1588_v53 = vsub.f32 %v1518_v38, %v799_v10  ;;  %v851_v34 = vsel %vm319_vm0, %v821_v32, 0.0  ;;  %855 = vadd.xlane.f32.xlu0 %v854_v7 }
 0x27a   : > { %852 = vadd.xlane.f32.xlu1 %v851_v34 }
 0x27b   : > { %v823_v28 = vmul.f32 %v1588_v53, %v1588_v53 }
 0x27d   : > { %v857_v60 = vsel %vm319_vm0, %v823_v28, 0.0 }
 0x27e   : > { %858 = vadd.xlane.f32.xlu1 %v857_v60 }
 0x2ec   : > { %v832_v3 = vpop.xlane.xlu0 %831 }
 0x2ed   : > { %v862_v15 = vmul.f32 0.020833334, %v832_v3 }
 0x2ef   : > { %v874_v21 = vadd.f32 1e-05, %v862_v15 }
 0x2f0   : > { %v826_v19 = vpop.xlane.xlu0 %825  ;;  %v835_v38 = vpop.xlane.xlu1 %834 }
 0x2f1   : > { %1231 = vrsqrt.f32 %v874_v21  ;;  %v860_v35 = vmul.f32 0.020833334, %v826_v19  ;;  %v863_v39 = vmul.f32 0.020833334, %v835_v38 }
 0x2f3   : > { %v872_v40 = vadd.f32 1e-05, %v860_v35  ;;  %v875_v20 = vadd.f32 1e-05, %v863_v39 }
 0x2f4   : > { %v829_v6 = vpop.xlane.xlu1 %828 }
 0x2f5   : > { %1233 = vrsqrt.f32 %v872_v40  ;;  %v861_v44 = vmul.f32 0.020833334, %v829_v6 }
 0x2f6   : > { %1235 = vrsqrt.f32 %v875_v20  ;;  %v844_v46 = vpop.xlane.xlu0 %843 }
 0x2f7   : > { %v873_v25 = vadd.f32 1e-05, %v861_v44  ;;  %v866_v48 = vmul.f32 0.020833334, %v844_v46 }
 0x2f8   : > { %v847_v12 = vpop.xlane.xlu1 %846 }
 0x2f9   : > { %1237 = vrsqrt.f32 %v873_v25  ;;  %v878_v52 = vadd.f32 1e-05, %v866_v48  ;;  %v867_v36 = vmul.f32 0.020833334, %v847_v12 }
 0x2fa   : > { %v838_v54 = vpop.xlane.xlu0 %837 }
 0x2fb   : > { %1239 = vrsqrt.f32 %v878_v52  ;;  %v879_v4 = vadd.f32 1e-05, %v867_v36  ;;  %v864_v55 = vmul.f32 0.020833334, %v838_v54 }
 0x2fc   : > { %v841_v43 = vpop.xlane.xlu1 %840 }
 0x2fd   : > { %1241 = vrsqrt.f32 %v879_v4  ;;  %v876_v8 = vadd.f32 1e-05, %v864_v55  ;;  %v865_v57 = vmul.f32 0.020833334, %v841_v43 }
 0x2fe   : > { %v1232_v33 = vpop.eup %1231  ;;  %v850_v37 = vpop.xlane.xlu0 %849 }
 0x2ff   : > { %v898_v58 = vmul.f32 %v1232_v33, %v1525_v16  ;;  %1243 = vrsqrt.f32 %v876_v8  ;;  %v877_v1 = vadd.f32 1e-05, %v865_v57  ;;  %v868_v59 = vmul.f32 0.020833334, %v850_v37 }
 0x301   : > { %v914_v0 = vmul.f32 %v1598_v29, %v898_v58  ;;  %1245 = vrsqrt.f32 %v877_v1  ;;  %v880_v13 = vadd.f32 1e-05, %v868_v59 }
 0x302   : > { %v1234_v41 = vpop.eup %1233  ;;  %v856_v14 = vpop.xlane.xlu0 %855 }
 0x303   : > { %v930_v16 = vadd.f32 %v1604_v63, %v914_v0  ;;  %v896_v62 = vmul.f32 %v1234_v41, %v1530_v42  ;;  %v853_v18 = vpop.xlane.xlu1 %852  ;;  %v1236_v22 = vpop.eup %1235  ;;  %1247 = vrsqrt.f32 %v880_v13  ;;  %v870_v24 = vmul.f32 0.020833334, %v856_v14 }
 0x304   : > { %v869_v11 = vmul.f32 0.020833334, %v853_v18  ;;  %v899_v23 = vmul.f32 %v1236_v22, %v1534_v47 }
 0x305   : > { %942 = vst.msk [vmem:[%s1612_s11 + $0x10] sm:$0xff] %vm319_vm0, %v930_v16  ;;  %v912_v61 = vmul.f32 %v1598_v29, %v896_v62  ;;  %v882_v30 = vadd.f32 1e-05, %v870_v24 }
 0x306   : > { %v881_v17 = vadd.f32 1e-05, %v869_v11  ;;  %v915_v9 = vmul.f32 %v1598_v29, %v899_v23  ;;  %v1238_v10 = vpop.eup %1237 }
 0x307   : > { %v928_v42 = vadd.f32 %v1604_v63, %v912_v61  ;;  %v859_v31 = vpop.xlane.xlu1 %858  ;;  %v897_v47 = vmul.f32 %v1238_v10, %v1539_v50 }
 0x308   : > { %1249 = vrsqrt.f32 %v881_v17  ;;  %v871_v32 = vmul.f32 0.020833334, %v859_v31  ;;  %v931_v49 = vadd.f32 %v1604_v63, %v915_v9  ;;  %v1240_v34 = vpop.eup %1239 }
 0x309   : > { %940 = vst.msk [vmem:[%s1612_s11] sm:$0xff] %vm319_vm0, %v928_v42  ;;  %1251 = vrsqrt.f32 %v882_v30  ;;  %v913_v28 = vmul.f32 %v1598_v29, %v897_v47  ;;  %v902_v60 = vmul.f32 %v1240_v34, %v1548_v56 }
 0x30a   : > { %v883_v7 = vadd.f32 1e-05, %v871_v32  ;;  %943 = vst.msk [vmem:[%s1612_s11 + $0x18] sm:$0xff] %vm319_vm0, %v931_v49  ;;  %v1242_v3 = vpop.eup %1241 }
 0x30b   : > { %v929_v15 = vadd.f32 %v1604_v63, %v913_v28  ;;  %v918_v21 = vmul.f32 %v1598_v29, %v902_v60  ;;  %v903_v19 = vmul.f32 %v1242_v3, %v1551_v51 }
 0x30c   : > { %1253 = vrsqrt.f32 %v883_v7  ;;  %v1244_v50 = vpop.eup %1243 }
 0x30d   : > { %941 = vst.msk [vmem:[%s1612_s11 + $0x8] sm:$0xff] %vm319_vm0, %v929_v15  ;;  %v934_v35 = vadd.f32 %v1604_v63, %v918_v21  ;;  %v919_v38 = vmul.f32 %v1598_v29, %v903_v19  ;;  %v900_v39 = vmul.f32 %v1244_v50, %v1559_v2 }
 0x30e   : > { %v1246_v56 = vpop.eup %1245 }
 0x30f   : > { %946 = vst.msk [vmem:[%s1612_s11 + $0x30] sm:$0xff] %vm319_vm0, %v934_v35  ;;  %v935_v40 = vadd.f32 %v1604_v63, %v919_v38  ;;  %v916_v20 = vmul.f32 %v1598_v29, %v900_v39  ;;  %v901_v51 = vmul.f32 %v1246_v56, %v1563_v5 }
 0x310   : > { %v1248_v6 = vpop.eup %1247 }
 0x311   : > { %947 = vst.msk [vmem:[%s1612_s11 + $0x38] sm:$0xff] %vm319_vm0, %v935_v40  ;;  %v932_v44 = vadd.f32 %v1604_v63, %v916_v20  ;;  %v917_v46 = vmul.f32 %v1598_v29, %v901_v51  ;;  %v904_v2 = vmul.f32 %v1248_v6, %v1570_v45 }
 0x313   : > { %944 = vst.msk [vmem:[%s1612_s11 + $0x20] sm:$0xff] %vm319_vm0, %v932_v44  ;;  %v933_v48 = vadd.f32 %v1604_v63, %v917_v46  ;;  %v920_v12 = vmul.f32 %v1598_v29, %v904_v2 }
 0x315   : > { %v1250_v25 = vpop.eup %1249  ;;  %945 = vst.msk [vmem:[%s1612_s11 + $0x28] sm:$0xff] %vm319_vm0, %v933_v48  ;;  %v936_v36 = vadd.f32 %v1604_v63, %v920_v12 }
 0x316   : > { %v1252_v5 = vpop.eup %1251  ;;  %v905_v52 = vmul.f32 %v1250_v25, %v1577_v26 }
 0x317   : > { %v906_v54 = vmul.f32 %v1252_v5, %v1580_v27  ;;  %948 = vst.msk [vmem:[%s1612_s11 + $0x40] sm:$0xff] %vm319_vm0, %v936_v36 }
 0x318   : > { %v921_v45 = vmul.f32 %v1598_v29, %v905_v52 }
 0x319   : > { %v1254_v4 = vpop.eup %1253  ;;  %v922_v55 = vmul.f32 %v1598_v29, %v906_v54 }
 0x31a   : > { %v937_v33 = vadd.f32 %v1604_v63, %v921_v45  ;;  %v907_v43 = vmul.f32 %v1254_v4, %v1588_v53 }
 0x31b   : > { %v938_v58 = vadd.f32 %v1604_v63, %v922_v55 }
 0x31c   : > { %949 = vst.msk [vmem:[%s1612_s11 + $0x48] sm:$0xff] %vm319_vm0, %v937_v33  ;;  %v923_v26 = vmul.f32 %v1598_v29, %v907_v43 }
 0x31d   : > { %950 = vst.msk [vmem:[%s1612_s11 + $0x50] sm:$0xff] %vm319_vm0, %v938_v58 }
 0x31e   : > { %v939_v27 = vadd.f32 %v1604_v63, %v923_v26 }
 0x320   : > { %951 = vst.msk [vmem:[%s1612_s11 + $0x58] sm:$0xff] %vm319_vm0, %v939_v27 }
 0x321 PF: > { %s17_s21 = sadd.s32 1, %s1261_s21  }
 0x322   : > { %p14_p4 = scmp.ge.s32.totalorder %s17_s21, 4  }
 0x324   :  { %16 = sbr.rel (!%p14_p4) target bundleno = 1 (0x1), region = 82 }

// kernel: tpu_custom_call.1
= control target key start
LH: loop header
LB: loop body
LE: loop exit
PB: predicated region body
PF: predicated region fallthrough
CT: control target
= control target key end

     0   :  { %s1298_s21 = smov 0   ;;  %s1675_s0 = inlined_call_operand.vmem [shape: f32[192,48], index: 0, kind: input, shape index: {}]   ;;  %s1676_s1 = inlined_call_operand.vmem [shape: bf16[48,64], index: 1, kind: input, shape index: {}]   ;;  %s1677_s2 = inlined_call_operand.vmem [shape: f32[1,64], index: 2, kind: input, shape index: {}]   ;;  %s1678_s3 = inlined_call_operand.vmem [shape: bf16[64,48], index: 3, kind: input, shape index: {}]   ;;  %s1679_s4 = inlined_call_operand.vmem [shape: f32[3,48], index: 4, kind: input, shape index: {}]   ;;  %s1680_s5 = inlined_call_operand.vmem [shape: bf16[192,64], index: 5, kind: output, shape index: {0}]   ;;  %s1681_s6 = inlined_call_operand.vmem [shape: f32[192,48], index: 6, kind: output, shape index: {1}]  }
   0x1 LB: > { %s1042_s22 = sadd.s32 4294967295, %s1261_s21   ;;  %p1046_p0 = scmp.ge.s32.totalorder %s1261_s21, 1  ;;  %s1261_s21 = sphi %s1298_s21, %s17_s21  }
   0x2   : > { %p216_p1 = scmp.lt.s32.totalorder %s1261_s21, 3 }
   0x4   : > { %p217_p2 = pnand %p1046_p0, %p216_p1 }
   0x5   : > { %s251_s25 = smul.u32 (!%p217_p2), 12, %s1042_s22 }
   0x6   : > { %220 = sbr.rel (%p217_p2) target bundleno = 801 (0x321), region = 40 }
   0x7   : > { %p252_p3 = scmp.lt.s32.totalorder (!%p217_p2), %s251_s25, 23 }
   0xb   : > { %v1176_v0 = vld [vmem:[%s1676_s1 + $0x10] sm:$0xff]   ;;  %v1177_v1 = vld [vmem:[%s1676_s1 + $0x8] sm:$0xff]   ;;  %v1179_v2 = vld [vmem:[%s1678_s3 + $0x18] sm:$0xff]   ;;  %s1683_s25 = smov (!%p252_p3, %s251_s25), 23  ;;  %vm319_vm0 = vcmask 392192   ;;  %vm467_vm1 = vcmask 519168  }
   0xc   : > { %1130 = vmatprep.subr.bf16.mxu0 %v1176_v0  ;;  %v1178_v3 = vld [vmem:[%s1676_s1] sm:$0xff]   ;;  %1148 = vmatprep.subr.bf16.mxu1 %v1179_v2  ;;  %s1047_s8 = sshll.u32 %s1683_s25, 3  ;;  %v1180_v22 = vld [vmem:[%s1678_s3 + $0x10] sm:$0xff]   ;;  %v1181_v23 = vld [vmem:[%s1678_s3 + $0x8] sm:$0xff]   ;;  %s1048_s20 = sshll.u32 %s1683_s25, 2  ;;  %vm517_vm2 = vcmask 523264  }
   0xd   : > { %1131 = vmatpush3.bf16.msra.mxu0 %v1176_v0  ;;  %1149 = vmatpush3.bf16.msra.mxu1 %v1179_v2  ;;  %s255_s11 = scalar_lea.vmem %s1675_s0, %s1047_s8  ;;  %v1182_v24 = vld [vmem:[%s1678_s3] sm:$0xff]   ;;  %s1384_s24 = scalar_lea.vmem %s1680_s5, %s1048_s20 }
   0xe   : > { %1132 = vmatprep.subr.bf16.mxu0 %v1177_v1  ;;  %v1326_v4 = vld [vmem:[%s255_s11] sm:$0xff]  ;;  %v1328_v5 = vld [vmem:[%s255_s11 + $0x8] sm:$0xff]  ;;  %v1330_v6 = vld [vmem:[%s255_s11 + $0x10] sm:$0xff]  ;;  %1150 = vmatprep.subr.bf16.mxu1 %v1180_v22 }
   0xf   : > { %v282_v7 = vpack.c.bf16 %v1328_v5, %v1326_v4  ;;  %v1334_v8 = vld [vmem:[%s255_s11 + $0x18] sm:$0xff]  ;;  %v1336_v9 = vld [vmem:[%s255_s11 + $0x20] sm:$0xff]  ;;  %v1338_v10 = vld [vmem:[%s255_s11 + $0x28] sm:$0xff] }
  0x10   : > { %v283_v11 = vpack.c.bf16 %v1334_v8, %v1330_v6  ;;  %v284_v12 = vpack.c.bf16 %v1338_v10, %v1336_v9  ;;  %v1347_v13 = vld [vmem:[%s255_s11 + $0x30] sm:$0xff]  ;;  %v1349_v14 = vld [vmem:[%s255_s11 + $0x38] sm:$0xff]  ;;  %v1351_v15 = vld [vmem:[%s255_s11 + $0x40] sm:$0xff] }
  0x11   : > { %1133 = vmatpush3.bf16.msra.mxu0 %v1177_v1  ;;  %1136 = vmatprep.mubr.msk.bf16.mxu0 %vm319_vm0, %v282_v7  ;;  %v1353_v16 = vld [vmem:[%s255_s11 + $0x48] sm:$0xff]  ;;  %v285_v17 = vpack.c.bf16 %v1349_v14, %v1347_v13  ;;  %v1361_v19 = vld [vmem:[%s255_s11 + $0x50] sm:$0xff]  ;;  %v1363_v20 = vld [vmem:[%s255_s11 + $0x58] sm:$0xff]  ;;  %s1612_s11 = scalar_lea.vmem %s1681_s6, %s1047_s8 }
  0x12   : > { %1134 = vmatprep.subr.bf16.mxu0 %v1178_v3  ;;  %v286_v18 = vpack.c.bf16 %v1353_v16, %v1351_v15  ;;  %v287_v21 = vpack.c.bf16 %v1363_v20, %v1361_v19  ;;  %1151 = vmatpush3.bf16.msra.mxu1 %v1180_v22  ;;  %v1050_v25 = vld [vmem:[%s1677_s2] ss:$0 sm:$0xff] }
  0x13   : > { %1152 = vmatprep.subr.bf16.mxu1 %v1181_v23  ;;  %v1072_v7 = vld [vmem:[%s1679_s4] ss:$0 sm:$0xff] }
  0x15   : > { %1135 = vmatpush3.bf16.msra.mxu0 %v1178_v3 }
  0x16   : > { %1153 = vmatpush3.bf16.msra.mxu1 %v1181_v23 }
  0x17   : > { %1154 = vmatprep.subr.bf16.mxu1 %v1182_v24 }
  0x18   : > { %1137 = vmatmul.mubr.msk.bf16.vlgmr.msra.gmra.mxu0 %vm319_vm0, %v283_v11 }
  0x19   : > { %1140 = vmatprep.mubr.msk.bf16.mxu0 %vm319_vm0, %v284_v12 }
  0x1a   : > { %1155 = vmatpush3.bf16.msra.mxu1 %v1182_v24 }
  0x20   : > { %1141 = vmatmul.mubr.msk.bf16.gmra.mxu0 %vm319_vm0, %v285_v17 }
  0x21   : > { %1144 = vmatprep.mubr.msk.bf16.mxu0 %vm319_vm0, %v286_v18 }
  0x28   : > { %1145 = vmatmul.mubr.msk.bf16.gmra.mxu0 %vm319_vm0, %v287_v21 }
  0xd8   : > { %v1138_v26 = vpop.f32.mrf.mxu0 }
  0xd9   : > { %v381_v27 = vadd.f32 %v1138_v26, %v1050_v25 }
  0xda   : > { %v372_v28 = vpop.f32.mrf.mxu0 }
  0xdb   : > { %v1101_v29 = vpack.c.bf16 %v381_v27, %v381_v27  ;;  %v373_v30 = vadd.f32 %v1050_v25, %v372_v28 }
  0xdc   : > { %v1139_v31 = vpop.f32.mrf.mxu0 }
  0xdd   : > { %470 = vst.msk [vmem:[%s1384_s24 + $0x8] sm:$0xf] %vm467_vm1, %v1101_v29  ;;  %v1099_v32 = vpack.c.bf16 %v373_v30, %v373_v30  ;;  %v384_v33 = vadd.f32 %v1139_v31, %v1050_v25 }
  0xde   : > { %v375_v34 = vpop.f32.mrf.mxu0 }
  0xdf   : > { %468 = vst.msk [vmem:[%s1384_s24] sm:$0xf] %vm467_vm1, %v1099_v32  ;;  %v1102_v35 = vpack.c.bf16 %v384_v33, %v384_v33  ;;  %v376_v36 = vadd.f32 %v1050_v25, %v375_v34  ;;  %v420_v41 = vpack.c.bf16 %v384_v33, %v381_v27 }
  0xe0   : > { %v1142_v37 = vpop.f32.mrf.mxu0 }
  0xe1   : > { %471 = vst.msk [vmem:[%s1384_s24 + $0xc] sm:$0xf] %vm467_vm1, %v1102_v35  ;;  %v1100_v38 = vpack.c.bf16 %v376_v36, %v376_v36  ;;  %v397_v39 = vadd.f32 %v1142_v37, %v1050_v25  ;;  %v419_v40 = vpack.c.bf16 %v376_v36, %v373_v30 }
  0xe2   : > { %v388_v42 = vpop.f32.mrf.mxu0 }
  0xe3   : > { %469 = vst.msk [vmem:[%s1384_s24 + $0x4] sm:$0xf] %vm467_vm1, %v1100_v38  ;;  %v1105_v43 = vpack.c.bf16 %v397_v39, %v397_v39  ;;  %v389_v44 = vadd.f32 %v1050_v25, %v388_v42  ;;  %1156 = vmatprep.mubr.msk.bf16.mxu1 %vm517_vm2, %v419_v40 }
  0xe4   : > { %v1143_v45 = vpop.f32.mrf.mxu0  ;;  %1157 = vmatmul.mubr.msk.bf16.vlgmr.msra.gmra.mxu1 %vm517_vm2, %v420_v41 }
  0xe5   : > { %474 = vst.msk [vmem:[%s1384_s24 + $0x18] sm:$0xf] %vm467_vm1, %v1105_v43  ;;  %v1103_v46 = vpack.c.bf16 %v389_v44, %v389_v44  ;;  %v400_v47 = vadd.f32 %v1143_v45, %v1050_v25 }
  0xe6   : > { %v391_v48 = vpop.f32.mrf.mxu0 }
  0xe7   : > { %472 = vst.msk [vmem:[%s1384_s24 + $0x10] sm:$0xf] %vm467_vm1, %v1103_v46  ;;  %v1106_v49 = vpack.c.bf16 %v400_v47, %v400_v47  ;;  %v392_v50 = vadd.f32 %v1050_v25, %v391_v48  ;;  %v422_v55 = vpack.c.bf16 %v400_v47, %v397_v39 }
  0xe8   : > { %v1146_v51 = vpop.f32.mrf.mxu0 }
  0xe9   : > { %475 = vst.msk [vmem:[%s1384_s24 + $0x1c] sm:$0xf] %vm467_vm1, %v1106_v49  ;;  %v421_v52 = vpack.c.bf16 %v392_v50, %v389_v44  ;;  %v1104_v53 = vpack.c.bf16 %v392_v50, %v392_v50  ;;  %v413_v54 = vadd.f32 %v1146_v51, %v1050_v25 }
  0xea   : > { %v404_v56 = vpop.f32.mrf.mxu0 }
  0xeb   : > { %473 = vst.msk [vmem:[%s1384_s24 + $0x14] sm:$0xf] %vm467_vm1, %v1104_v53  ;;  %v1109_v57 = vpack.c.bf16 %v413_v54, %v413_v54  ;;  %v405_v58 = vadd.f32 %v1050_v25, %v404_v56  ;;  %1160 = vmatprep.mubr.msk.bf16.mxu1 %vm517_vm2, %v421_v52 }
  0xec   : > { %v1147_v59 = vpop.f32.mrf.mxu0  ;;  %1161 = vmatmul.mubr.msk.bf16.gmra.mxu1 %vm517_vm2, %v422_v55 }
  0xed   : > { %478 = vst.msk [vmem:[%s1384_s24 + $0x28] sm:$0xf] %vm467_vm1, %v1109_v57  ;;  %v1107_v60 = vpack.c.bf16 %v405_v58, %v405_v58  ;;  %v416_v61 = vadd.f32 %v1147_v59, %v1050_v25 }
  0xee   : > { %v407_v62 = vpop.f32.mrf.mxu0 }
  0xef   : > { %476 = vst.msk [vmem:[%s1384_s24 + $0x20] sm:$0xf] %vm467_vm1, %v1107_v60  ;;  %v1110_v63 = vpack.c.bf16 %v416_v61, %v416_v61  ;;  %v408_v0 = vadd.f32 %v1050_v25, %v407_v62  ;;  %v424_v3 = vpack.c.bf16 %v416_v61, %v413_v54 }
  0xf1   : > { %479 = vst.msk [vmem:[%s1384_s24 + $0x2c] sm:$0xf] %vm467_vm1, %v1110_v63  ;;  %v423_v1 = vpack.c.bf16 %v408_v0, %v405_v58  ;;  %v1108_v2 = vpack.c.bf16 %v408_v0, %v408_v0 }
  0xf3   : > { %477 = vst.msk [vmem:[%s1384_s24 + $0x24] sm:$0xf] %vm467_vm1, %v1108_v2  ;;  %1164 = vmatprep.mubr.msk.bf16.mxu1 %vm517_vm2, %v423_v1 }
  0xf4   : > { %1165 = vmatmul.mubr.msk.bf16.gmra.mxu1 %vm517_vm2, %v424_v3 }
 0x1a4   : > { %v1158_v11 = vpop.f32.mrf.mxu1 }
 0x1a5   : > { %v1419_v12 = vadd.f32 %v1158_v11, %v1072_v7 }
 0x1a6   : > { %v570_v17 = vpop.f32.mrf.mxu1 }
 0x1a7   : > { %v619_v18 = vmin.f32 %v1419_v12, 20.0  ;;  %v1422_v21 = vadd.f32 %v1072_v7, %v570_v17 }
 0x1a8   : > { %v1159_v22 = vpop.f32.mrf.mxu1 }
 0x1a9   : > { %v633_v23 = vmul.f32 1.442695, %v619_v18  ;;  %v617_v24 = vmin.f32 %v1422_v21, 20.0  ;;  %v1425_v25 = vadd.f32 %v1159_v22, %v1072_v7 }
 0x1aa   : > { %v573_v26 = vpop.f32.mrf.mxu1 }
 0x1ab   : > { %1183 = vpow2.f32 %v633_v23  ;;  %v629_v27 = vmul.f32 1.442695, %v617_v24  ;;  %v620_v28 = vmin.f32 %v1425_v25, 20.0  ;;  %v1428_v29 = vadd.f32 %v1072_v7, %v573_v26 }
 0x1ac   : > { %v1162_v30 = vpop.f32.mrf.mxu1 }
 0x1ad   : > { %1185 = vpow2.f32 %v629_v27  ;;  %v635_v31 = vmul.f32 1.442695, %v620_v28  ;;  %v618_v32 = vmin.f32 %v1428_v29, 20.0  ;;  %v1431_v33 = vadd.f32 %v1162_v30, %v1072_v7 }
 0x1ae   : > { %v586_v34 = vpop.f32.mrf.mxu1 }
 0x1af   : > { %1187 = vpow2.f32 %v635_v31  ;;  %v631_v35 = vmul.f32 1.442695, %v618_v32  ;;  %v623_v36 = vmin.f32 %v1431_v33, 20.0  ;;  %v1434_v37 = vadd.f32 %v1072_v7, %v586_v34 }
 0x1b0   : > { %v1163_v38 = vpop.f32.mrf.mxu1 }
 0x1b1   : > { %1189 = vpow2.f32 %v631_v35  ;;  %v641_v39 = vmul.f32 1.442695, %v623_v36  ;;  %v621_v40 = vmin.f32 %v1434_v37, 20.0  ;;  %v1437_v41 = vadd.f32 %v1163_v38, %v1072_v7 }
 0x1b2   : > { %v589_v42 = vpop.f32.mrf.mxu1 }
 0x1b3   : > { %1191 = vpow2.f32 %v641_v39  ;;  %v637_v43 = vmul.f32 1.442695, %v621_v40  ;;  %v624_v44 = vmin.f32 %v1437_v41, 20.0  ;;  %v1440_v45 = vadd.f32 %v1072_v7, %v589_v42 }
 0x1b4   : > { %v1166_v46 = vpop.f32.mrf.mxu1 }
 0x1b5   : > { %1193 = vpow2.f32 %v637_v43  ;;  %v643_v47 = vmul.f32 1.442695, %v624_v44  ;;  %v622_v48 = vmin.f32 %v1440_v45, 20.0  ;;  %v1443_v49 = vadd.f32 %v1166_v46, %v1072_v7 }
 0x1b6   : > { %v602_v50 = vpop.f32.mrf.mxu1 }
 0x1b7   : > { %1195 = vpow2.f32 %v643_v47  ;;  %v639_v51 = vmul.f32 1.442695, %v622_v48  ;;  %v627_v52 = vmin.f32 %v1443_v49, 20.0  ;;  %v1446_v53 = vadd.f32 %v1072_v7, %v602_v50 }
 0x1b8   : > { %v1184_v54 = vpop.eup %1183  ;;  %v1167_v55 = vpop.f32.mrf.mxu1 }
 0x1b9   : > { %v655_v56 = vadd.f32 1.0, %v1184_v54  ;;  %1197 = vpow2.f32 %v639_v51  ;;  %v649_v57 = vmul.f32 1.442695, %v627_v52  ;;  %v625_v58 = vmin.f32 %v1446_v53, 20.0 }
 0x1ba   : > { %v1186_v59 = vpop.eup %1185  ;;  %v1449_v60 = vadd.f32 %v1167_v55, %v1072_v7  ;;  %v605_v61 = vpop.f32.mrf.mxu1 }
 0x1bb   : > { %v667_v62 = vmul.f32 %v655_v56, %v655_v56  ;;  %v653_v63 = vadd.f32 1.0, %v1186_v59  ;;  %1199 = vpow2.f32 %v649_v57  ;;  %v645_v0 = vmul.f32 1.442695, %v625_v58 }
 0x1bc   : > { %v1188_v1 = vpop.eup %1187  ;;  %v628_v2 = vmin.f32 %v1449_v60, 20.0  ;;  %v1452_v3 = vadd.f32 %v1072_v7, %v605_v61 }
 0x1bd   : > { %v703_v11 = vadd.f32 1.0, %v667_v62  ;;  %v665_v17 = vmul.f32 %v653_v63, %v653_v63  ;;  %v656_v18 = vadd.f32 1.0, %v1188_v1  ;;  %1201 = vpow2.f32 %v645_v0 }
 0x1be   : > { %v1190_v22 = vpop.eup %1189  ;;  %v651_v23 = vmul.f32 1.442695, %v628_v2  ;;  %v626_v24 = vmin.f32 %v1452_v3, 20.0  ;;  %v1085_v47 = vadd.f32 -1.0, %v667_v62 }
 0x1bf   : > { %1203 = vrcp.f32 %v703_v11  ;;  %v701_v26 = vadd.f32 1.0, %v665_v17  ;;  %v668_v28 = vmul.f32 %v656_v18, %v656_v18  ;;  %v654_v30 = vadd.f32 1.0, %v1190_v22 }
 0x1c0   : > { %v1192_v27 = vpop.eup %1191  ;;  %1205 = vpow2.f32 %v651_v23  ;;  %v647_v31 = vmul.f32 1.442695, %v626_v24  ;;  %v1083_v55 = vadd.f32 -1.0, %v665_v17  ;;  %v691_v59 = vmul.f32 %v1085_v47, %v1419_v12 }
 0x1c1   : > { %1207 = vrcp.f32 %v701_v26  ;;  %v659_v32 = vadd.f32 1.0, %v1192_v27  ;;  %v704_v7 = vadd.f32 1.0, %v668_v28  ;;  %v666_v35 = vmul.f32 %v654_v30, %v654_v30 }
 0x1c2   : > { %v1194_v34 = vpop.eup %1193  ;;  %1209 = vpow2.f32 %v647_v31  ;;  %v1086_v2 = vadd.f32 -1.0, %v668_v28  ;;  %v689_v23 = vmul.f32 %v1083_v55, %v1422_v21 }
 0x1c3   : > { %v671_v36 = vmul.f32 %v659_v32, %v659_v32  ;;  %v657_v38 = vadd.f32 1.0, %v1194_v34  ;;  %1211 = vrcp.f32 %v704_v7  ;;  %v702_v40 = vadd.f32 1.0, %v666_v35 }
 0x1c4   : > { %v1196_v39 = vpop.eup %1195  ;;  %v1084_v24 = vadd.f32 -1.0, %v666_v35  ;;  %v692_v28 = vmul.f32 %v1086_v2, %v1425_v25 }
 0x1c5   : > { %v707_v42 = vadd.f32 1.0, %v671_v36  ;;  %v669_v43 = vmul.f32 %v657_v38, %v657_v38  ;;  %v660_v44 = vadd.f32 1.0, %v1196_v39  ;;  %1213 = vrcp.f32 %v702_v40 }
 0x1c6   : > { %v1198_v46 = vpop.eup %1197  ;;  %v1089_v27 = vadd.f32 -1.0, %v671_v36  ;;  %v690_v35 = vmul.f32 %v1084_v24, %v1428_v29 }
 0x1c7   : > { %1215 = vrcp.f32 %v707_v42  ;;  %v705_v48 = vadd.f32 1.0, %v669_v43  ;;  %v672_v51 = vmul.f32 %v660_v44, %v660_v44  ;;  %v658_v52 = vadd.f32 1.0, %v1198_v46 }
 0x1c8   : > { %v1200_v50 = vpop.eup %1199  ;;  %v695_v42 = vmul.f32 %v1089_v27, %v1431_v33  ;;  %v1087_v44 = vadd.f32 -1.0, %v669_v43 }
 0x1c9   : > { %1217 = vrcp.f32 %v705_v48  ;;  %v663_v54 = vadd.f32 1.0, %v1200_v50  ;;  %v708_v56 = vadd.f32 1.0, %v672_v51  ;;  %v670_v57 = vmul.f32 %v658_v52, %v658_v52 }
 0x1ca   : > { %v1202_v58 = vpop.eup %1201  ;;  %v1090_v47 = vadd.f32 -1.0, %v672_v51  ;;  %v693_v33 = vmul.f32 %v1087_v44, %v1434_v37 }
 0x1cb   : > { %v675_v61 = vmul.f32 %v663_v54, %v663_v54  ;;  %1219 = vrcp.f32 %v708_v56  ;;  %v706_v0 = vadd.f32 1.0, %v670_v57  ;;  %v661_v11 = vadd.f32 1.0, %v1202_v58 }
 0x1cc   : > { %v1204_v63 = vpop.eup %1203  ;;  %v1088_v55 = vadd.f32 -1.0, %v670_v57  ;;  %v696_v56 = vmul.f32 %v1090_v47, %v1437_v41 }
 0x1cd   : > { %v1206_v1 = vpop.eup %1205  ;;  %v711_v62 = vadd.f32 1.0, %v675_v61  ;;  %v727_v18 = vmul.f32 %v1204_v63, %v691_v59  ;;  %1221 = vrcp.f32 %v706_v0  ;;  %v673_v30 = vmul.f32 %v661_v11, %v661_v11 }
 0x1ce   : > { %v1208_v22 = vpop.eup %1207  ;;  %v664_v17 = vadd.f32 1.0, %v1206_v1  ;;  %v694_v63 = vmul.f32 %v1088_v55, %v1440_v45  ;;  %v1093_v1 = vadd.f32 -1.0, %v675_v61 }
 0x1cf   : > { %v1210_v26 = vpop.eup %1209  ;;  %v1458_v12 = vadd.f32 %v727_v18, %v1330_v6  ;;  %v725_v34 = vmul.f32 %v1208_v22, %v689_v23  ;;  %1223 = vrcp.f32 %v711_v62  ;;  %v709_v38 = vadd.f32 1.0, %v673_v30 }
 0x1d0   : > { %v676_v31 = vmul.f32 %v664_v17, %v664_v17  ;;  %v662_v32 = vadd.f32 1.0, %v1210_v26  ;;  %v1212_v7 = vpop.eup %1211  ;;  %v1091_v2 = vadd.f32 -1.0, %v673_v30 }
 0x1d1   : > { %v757_v21 = vsel %vm319_vm0, %v1458_v12, 0.0  ;;  %v1465_v36 = vadd.f32 %v725_v34, %v1326_v4  ;;  %1225 = vrcp.f32 %v709_v38  ;;  %v728_v46 = vmul.f32 %v1212_v7, %v692_v28 }
 0x1d2   : > { %v712_v39 = vadd.f32 1.0, %v676_v31  ;;  %v674_v40 = vmul.f32 %v662_v32, %v662_v32  ;;  %758 = vadd.xlane.f32.xlu1 %v757_v21  ;;  %v1214_v6 = vpop.eup %1213  ;;  %v1094_v18 = vadd.f32 -1.0, %v676_v31  ;;  %v697_v23 = vmul.f32 %v1091_v2, %v1446_v53 }
 0x1d3   : > { %v751_v50 = vsel %vm319_vm0, %v1465_v36, 0.0  ;;  %v1471_v29 = vadd.f32 %v728_v46, %v1334_v8  ;;  %v726_v52 = vmul.f32 %v1214_v6, %v690_v35 }
 0x1d4   : > { %v1216_v25 = vpop.eup %1215  ;;  %1227 = vrcp.f32 %v712_v39  ;;  %v710_v48 = vadd.f32 1.0, %v674_v40  ;;  %752 = vadd.xlane.f32.xlu0 %v751_v50  ;;  %v1092_v22 = vadd.f32 -1.0, %v674_v40  ;;  %v700_v30 = vmul.f32 %v1094_v18, %v1449_v60 }
 0x1d5   : > { %v731_v54 = vmul.f32 %v1216_v25, %v695_v42  ;;  %v760_v43 = vsel %vm319_vm0, %v1471_v29, 0.0  ;;  %v1477_v51 = vadd.f32 %v726_v52, %v1328_v5 }
 0x1d6   : > { %v1218_v4 = vpop.eup %1217  ;;  %1229 = vrcp.f32 %v710_v48  ;;  %761 = vadd.xlane.f32.xlu1 %v760_v43  ;;  %v698_v31 = vmul.f32 %v1092_v22, %v1452_v3 }
 0x1d7   : > { %v754_v8 = vsel %vm319_vm0, %v1477_v51, 0.0  ;;  %v1483_v59 = vadd.f32 %v731_v54, %v1347_v13  ;;  %v729_v57 = vmul.f32 %v1218_v4, %v693_v33 }
 0x1d8   : > { %v1220_v58 = vpop.eup %1219  ;;  %755 = vadd.xlane.f32.xlu0 %v754_v8 }
 0x1d9   : > { %v732_v37 = vmul.f32 %v1220_v58, %v696_v56  ;;  %v769_v62 = vsel %vm319_vm0, %v1483_v59, 0.0  ;;  %v1492_v11 = vadd.f32 %v729_v57, %v1336_v9 }
 0x1da   : > { %v1222_v0 = vpop.eup %1221 }
 0x1db   : > { %v1487_v5 = vadd.f32 %v732_v37, %v1349_v14  ;;  %v730_v41 = vmul.f32 %v1222_v0, %v694_v63  ;;  %v699_v14 = vmul.f32 %v1093_v1, %v1443_v49  ;;  %v763_v9 = vsel %vm319_vm0, %v1492_v11, 0.0 }
 0x1dc   : > { %v1224_v13 = vpop.eup %1223  ;;  %770 = vadd.xlane.f32.xlu0 %v769_v62 }
 0x1dd   : > { %v772_v45 = vsel %vm319_vm0, %v1487_v5, 0.0  ;;  %v1497_v61 = vadd.f32 %v730_v41, %v1338_v10  ;;  %v735_v27 = vmul.f32 %v1224_v13, %v699_v14 }
 0x1de   : > { %773 = vadd.xlane.f32.xlu1 %v772_v45  ;;  %v1226_v24 = vpop.eup %1225 }
 0x1df   : > { %v733_v26 = vmul.f32 %v1226_v24, %v697_v23  ;;  %v766_v10 = vsel %vm319_vm0, %v1497_v61, 0.0  ;;  %v1510_v28 = vadd.f32 %v735_v27, %v1361_v19 }
 0x1e0   : > { %764 = vadd.xlane.f32.xlu0 %v763_v9 }
 0x1e1   : > { %v1228_v17 = vpop.eup %1227  ;;  %v745_v49 = vadd.f32 %v733_v26, %v1351_v15  ;;  %v781_v15 = vsel %vm319_vm0, %v1510_v28, 0.0 }
 0x1e2   : > { %767 = vadd.xlane.f32.xlu1 %v766_v10  ;;  %v736_v34 = vmul.f32 %v1228_v17, %v700_v30 }
 0x1e3   : > { %v1230_v32 = vpop.eup %1229  ;;  %v775_v7 = vsel %vm319_vm0, %v745_v49, 0.0 }
 0x1e4   : > { %v734_v53 = vmul.f32 %v1230_v32, %v698_v31  ;;  %776 = vadd.xlane.f32.xlu0 %v775_v7  ;;  %v1518_v38 = vadd.f32 %v736_v34, %v1363_v20 }
 0x1e6   : > { %v1513_v60 = vadd.f32 %v734_v53, %v1353_v16  ;;  %v784_v21 = vsel %vm319_vm0, %v1518_v38, 0.0 }
 0x1e8   : > { %v778_v3 = vsel %vm319_vm0, %v1513_v60, 0.0  ;;  %782 = vadd.xlane.f32.xlu0 %v781_v15 }
 0x1e9   : > { %779 = vadd.xlane.f32.xlu1 %v778_v3 }
 0x1ed   : > { %785 = vadd.xlane.f32.xlu1 %v784_v21 }
 0x25b   : > { %v759_v19 = vpop.xlane.xlu1 %758 }
 0x25c   : > { %v790_v35 = vmul.f32 0.020833334, %v759_v19 }
 0x25d   : > { %v753_v39 = vpop.xlane.xlu0 %752 }
 0x25e   : > { %v1525_v16 = vsub.f32 %v1458_v12, %v790_v35  ;;  %v788_v40 = vmul.f32 0.020833334, %v753_v39 }
 0x25f   : > { %v762_v6 = vpop.xlane.xlu1 %761 }
 0x260   : > { %v814_v20 = vmul.f32 %v1525_v16, %v1525_v16  ;;  %v1530_v42 = vsub.f32 %v1465_v36, %v788_v40  ;;  %v791_v44 = vmul.f32 0.020833334, %v762_v6 }
 0x261   : > { %v756_v25 = vpop.xlane.xlu0 %755 }
 0x262   : > { %v830_v46 = vsel %vm319_vm0, %v814_v20, 0.0  ;;  %v1534_v47 = vsub.f32 %v1471_v29, %v791_v44  ;;  %v789_v48 = vmul.f32 0.020833334, %v756_v25  ;;  %v812_v12 = vmul.f32 %v1530_v42, %v1530_v42 }
 0x263   : > { %831 = vadd.xlane.f32.xlu0 %v830_v46 }
 0x264   : > { %v1539_v50 = vsub.f32 %v1477_v51, %v789_v48  ;;  %v815_v52 = vmul.f32 %v1534_v47, %v1534_v47  ;;  %v824_v36 = vsel %vm319_vm0, %v812_v12, 0.0 }
 0x265   : > { %v771_v54 = vpop.xlane.xlu0 %770 }
 0x266   : > { %v794_v4 = vmul.f32 0.020833334, %v771_v54  ;;  %v833_v33 = vsel %vm319_vm0, %v815_v52, 0.0  ;;  %v813_v29 = vmul.f32 %v1539_v50, %v1539_v50 }
 0x267   : > { %825 = vadd.xlane.f32.xlu0 %v824_v36  ;;  %v774_v55 = vpop.xlane.xlu1 %773  ;;  %834 = vadd.xlane.f32.xlu1 %v833_v33 }
 0x268   : > { %v795_v43 = vmul.f32 0.020833334, %v774_v55  ;;  %v1548_v56 = vsub.f32 %v1483_v59, %v794_v4  ;;  %v827_v63 = vsel %vm319_vm0, %v813_v29, 0.0  ;;  %v1598_v29 = vld [vmem:[%s1679_s4 + $0x1] ss:$0 sm:$0xff] }
 0x269   : > { %v765_v58 = vpop.xlane.xlu0 %764 }
 0x26a   : > { %v1551_v51 = vsub.f32 %v1487_v5, %v795_v43  ;;  %v792_v8 = vmul.f32 0.020833334, %v765_v58  ;;  %v818_v37 = vmul.f32 %v1548_v56, %v1548_v56 }
 0x26b   : > { %v768_v57 = vpop.xlane.xlu1 %767  ;;  %828 = vadd.xlane.f32.xlu1 %v827_v63  ;;  %v1604_v63 = vld [vmem:[%s1679_s4 + $0x2] ss:$0 sm:$0xff] }
 0x26c   : > { %v793_v0 = vmul.f32 0.020833334, %v768_v57  ;;  %v819_v1 = vmul.f32 %v1551_v51, %v1551_v51  ;;  %v1559_v2 = vsub.f32 %v1492_v11, %v792_v8  ;;  %v842_v59 = vsel %vm319_vm0, %v818_v37, 0.0 }
 0x26d   : > { %843 = vadd.xlane.f32.xlu0 %v842_v59  ;;  %v777_v41 = vpop.xlane.xlu0 %776 }
 0x26e   : > { %v1563_v5 = vsub.f32 %v1497_v61, %v793_v0  ;;  %v845_v62 = vsel %vm319_vm0, %v819_v1, 0.0  ;;  %v796_v13 = vmul.f32 0.020833334, %v777_v41  ;;  %v816_v18 = vmul.f32 %v1559_v2, %v1559_v2 }
 0x26f   : > { %846 = vadd.xlane.f32.xlu1 %v845_v62 }
 0x270   : > { %v817_v22 = vmul.f32 %v1563_v5, %v1563_v5  ;;  %v1570_v45 = vsub.f32 %v745_v49, %v796_v13  ;;  %v836_v14 = vsel %vm319_vm0, %v816_v18, 0.0 }
 0x271   : > { %837 = vadd.xlane.f32.xlu0 %v836_v14  ;;  %v783_v61 = vpop.xlane.xlu0 %782 }
 0x272   : > { %v780_v11 = vpop.xlane.xlu1 %779  ;;  %v839_v24 = vsel %vm319_vm0, %v817_v22, 0.0  ;;  %v798_v17 = vmul.f32 0.020833334, %v783_v61  ;;  %v820_v9 = vmul.f32 %v1570_v45, %v1570_v45 }
 0x273   : > { %v797_v23 = vmul.f32 0.020833334, %v780_v11  ;;  %840 = vadd.xlane.f32.xlu1 %v839_v24 }
 0x274   : > { %v1580_v27 = vsub.f32 %v1510_v28, %v798_v17  ;;  %v848_v31 = vsel %vm319_vm0, %v820_v9, 0.0 }
 0x275   : > { %v1577_v26 = vsub.f32 %v1513_v60, %v797_v23  ;;  %849 = vadd.xlane.f32.xlu0 %v848_v31 }
 0x276   : > { %v786_v30 = vpop.xlane.xlu1 %785  ;;  %v822_v49 = vmul.f32 %v1580_v27, %v1580_v27 }
 0x277   : > { %v799_v10 = vmul.f32 0.020833334, %v786_v30  ;;  %v821_v32 = vmul.f32 %v1577_v26, %v1577_v26 }
 0x278   : > { %v854_v7 = vsel %vm319_vm0, %v822_v49, 0.0 }
 0x279   : > { %v1588_v53 = vsub.f32 %v1518_v38, %v799_v10  ;;  %v851_v34 = vsel %vm319_vm0, %v821_v32, 0.0  ;;  %855 = vadd.xlane.f32.xlu0 %v854_v7 }
 0x27a   : > { %852 = vadd.xlane.f32.xlu1 %v851_v34 }
 0x27b   : > { %v823_v28 = vmul.f32 %v1588_v53, %v1588_v53 }
 0x27d   : > { %v857_v60 = vsel %vm319_vm0, %v823_v28, 0.0 }
 0x27e   : > { %858 = vadd.xlane.f32.xlu1 %v857_v60 }
 0x2ec   : > { %v832_v3 = vpop.xlane.xlu0 %831 }
 0x2ed   : > { %v862_v15 = vmul.f32 0.020833334, %v832_v3 }
 0x2ef   : > { %v874_v21 = vadd.f32 1e-05, %v862_v15 }
 0x2f0   : > { %v826_v19 = vpop.xlane.xlu0 %825  ;;  %v835_v38 = vpop.xlane.xlu1 %834 }
 0x2f1   : > { %1231 = vrsqrt.f32 %v874_v21  ;;  %v860_v35 = vmul.f32 0.020833334, %v826_v19  ;;  %v863_v39 = vmul.f32 0.020833334, %v835_v38 }
 0x2f3   : > { %v872_v40 = vadd.f32 1e-05, %v860_v35  ;;  %v875_v20 = vadd.f32 1e-05, %v863_v39 }
 0x2f4   : > { %v829_v6 = vpop.xlane.xlu1 %828 }
 0x2f5   : > { %1233 = vrsqrt.f32 %v872_v40  ;;  %v861_v44 = vmul.f32 0.020833334, %v829_v6 }
 0x2f6   : > { %1235 = vrsqrt.f32 %v875_v20  ;;  %v844_v46 = vpop.xlane.xlu0 %843 }
 0x2f7   : > { %v873_v25 = vadd.f32 1e-05, %v861_v44  ;;  %v866_v48 = vmul.f32 0.020833334, %v844_v46 }
 0x2f8   : > { %v847_v12 = vpop.xlane.xlu1 %846 }
 0x2f9   : > { %1237 = vrsqrt.f32 %v873_v25  ;;  %v878_v52 = vadd.f32 1e-05, %v866_v48  ;;  %v867_v36 = vmul.f32 0.020833334, %v847_v12 }
 0x2fa   : > { %v838_v54 = vpop.xlane.xlu0 %837 }
 0x2fb   : > { %1239 = vrsqrt.f32 %v878_v52  ;;  %v879_v4 = vadd.f32 1e-05, %v867_v36  ;;  %v864_v55 = vmul.f32 0.020833334, %v838_v54 }
 0x2fc   : > { %v841_v43 = vpop.xlane.xlu1 %840 }
 0x2fd   : > { %1241 = vrsqrt.f32 %v879_v4  ;;  %v876_v8 = vadd.f32 1e-05, %v864_v55  ;;  %v865_v57 = vmul.f32 0.020833334, %v841_v43 }
 0x2fe   : > { %v1232_v33 = vpop.eup %1231  ;;  %v850_v37 = vpop.xlane.xlu0 %849 }
 0x2ff   : > { %v898_v58 = vmul.f32 %v1232_v33, %v1525_v16  ;;  %1243 = vrsqrt.f32 %v876_v8  ;;  %v877_v1 = vadd.f32 1e-05, %v865_v57  ;;  %v868_v59 = vmul.f32 0.020833334, %v850_v37 }
 0x301   : > { %v914_v0 = vmul.f32 %v1598_v29, %v898_v58  ;;  %1245 = vrsqrt.f32 %v877_v1  ;;  %v880_v13 = vadd.f32 1e-05, %v868_v59 }
 0x302   : > { %v1234_v41 = vpop.eup %1233  ;;  %v856_v14 = vpop.xlane.xlu0 %855 }
 0x303   : > { %v930_v16 = vadd.f32 %v1604_v63, %v914_v0  ;;  %v896_v62 = vmul.f32 %v1234_v41, %v1530_v42  ;;  %v853_v18 = vpop.xlane.xlu1 %852  ;;  %v1236_v22 = vpop.eup %1235  ;;  %1247 = vrsqrt.f32 %v880_v13  ;;  %v870_v24 = vmul.f32 0.020833334, %v856_v14 }
 0x304   : > { %v869_v11 = vmul.f32 0.020833334, %v853_v18  ;;  %v899_v23 = vmul.f32 %v1236_v22, %v1534_v47 }
 0x305   : > { %942 = vst.msk [vmem:[%s1612_s11 + $0x10] sm:$0xff] %vm319_vm0, %v930_v16  ;;  %v912_v61 = vmul.f32 %v1598_v29, %v896_v62  ;;  %v882_v30 = vadd.f32 1e-05, %v870_v24 }
 0x306   : > { %v881_v17 = vadd.f32 1e-05, %v869_v11  ;;  %v915_v9 = vmul.f32 %v1598_v29, %v899_v23  ;;  %v1238_v10 = vpop.eup %1237 }
 0x307   : > { %v928_v42 = vadd.f32 %v1604_v63, %v912_v61  ;;  %v859_v31 = vpop.xlane.xlu1 %858  ;;  %v897_v47 = vmul.f32 %v1238_v10, %v1539_v50 }
 0x308   : > { %1249 = vrsqrt.f32 %v881_v17  ;;  %v871_v32 = vmul.f32 0.020833334, %v859_v31  ;;  %v931_v49 = vadd.f32 %v1604_v63, %v915_v9  ;;  %v1240_v34 = vpop.eup %1239 }
 0x309   : > { %940 = vst.msk [vmem:[%s1612_s11] sm:$0xff] %vm319_vm0, %v928_v42  ;;  %1251 = vrsqrt.f32 %v882_v30  ;;  %v913_v28 = vmul.f32 %v1598_v29, %v897_v47  ;;  %v902_v60 = vmul.f32 %v1240_v34, %v1548_v56 }
 0x30a   : > { %v883_v7 = vadd.f32 1e-05, %v871_v32  ;;  %943 = vst.msk [vmem:[%s1612_s11 + $0x18] sm:$0xff] %vm319_vm0, %v931_v49  ;;  %v1242_v3 = vpop.eup %1241 }
 0x30b   : > { %v929_v15 = vadd.f32 %v1604_v63, %v913_v28  ;;  %v918_v21 = vmul.f32 %v1598_v29, %v902_v60  ;;  %v903_v19 = vmul.f32 %v1242_v3, %v1551_v51 }
 0x30c   : > { %1253 = vrsqrt.f32 %v883_v7  ;;  %v1244_v50 = vpop.eup %1243 }
 0x30d   : > { %941 = vst.msk [vmem:[%s1612_s11 + $0x8] sm:$0xff] %vm319_vm0, %v929_v15  ;;  %v934_v35 = vadd.f32 %v1604_v63, %v918_v21  ;;  %v919_v38 = vmul.f32 %v1598_v29, %v903_v19  ;;  %v900_v39 = vmul.f32 %v1244_v50, %v1559_v2 }
 0x30e   : > { %v1246_v56 = vpop.eup %1245 }
 0x30f   : > { %946 = vst.msk [vmem:[%s1612_s11 + $0x30] sm:$0xff] %vm319_vm0, %v934_v35  ;;  %v935_v40 = vadd.f32 %v1604_v63, %v919_v38  ;;  %v916_v20 = vmul.f32 %v1598_v29, %v900_v39  ;;  %v901_v51 = vmul.f32 %v1246_v56, %v1563_v5 }
 0x310   : > { %v1248_v6 = vpop.eup %1247 }
 0x311   : > { %947 = vst.msk [vmem:[%s1612_s11 + $0x38] sm:$0xff] %vm319_vm0, %v935_v40  ;;  %v932_v44 = vadd.f32 %v1604_v63, %v916_v20  ;;  %v917_v46 = vmul.f32 %v1598_v29, %v901_v51  ;;  %v904_v2 = vmul.f32 %v1248_v6, %v1570_v45 }
 0x313   : > { %944 = vst.msk [vmem:[%s1612_s11 + $0x20] sm:$0xff] %vm319_vm0, %v932_v44  ;;  %v933_v48 = vadd.f32 %v1604_v63, %v917_v46  ;;  %v920_v12 = vmul.f32 %v1598_v29, %v904_v2 }
 0x315   : > { %v1250_v25 = vpop.eup %1249  ;;  %945 = vst.msk [vmem:[%s1612_s11 + $0x28] sm:$0xff] %vm319_vm0, %v933_v48  ;;  %v936_v36 = vadd.f32 %v1604_v63, %v920_v12 }
 0x316   : > { %v1252_v5 = vpop.eup %1251  ;;  %v905_v52 = vmul.f32 %v1250_v25, %v1577_v26 }
 0x317   : > { %v906_v54 = vmul.f32 %v1252_v5, %v1580_v27  ;;  %948 = vst.msk [vmem:[%s1612_s11 + $0x40] sm:$0xff] %vm319_vm0, %v936_v36 }
 0x318   : > { %v921_v45 = vmul.f32 %v1598_v29, %v905_v52 }
 0x319   : > { %v1254_v4 = vpop.eup %1253  ;;  %v922_v55 = vmul.f32 %v1598_v29, %v906_v54 }
 0x31a   : > { %v937_v33 = vadd.f32 %v1604_v63, %v921_v45  ;;  %v907_v43 = vmul.f32 %v1254_v4, %v1588_v53 }
 0x31b   : > { %v938_v58 = vadd.f32 %v1604_v63, %v922_v55 }
 0x31c   : > { %949 = vst.msk [vmem:[%s1612_s11 + $0x48] sm:$0xff] %vm319_vm0, %v937_v33  ;;  %v923_v26 = vmul.f32 %v1598_v29, %v907_v43 }
 0x31d   : > { %950 = vst.msk [vmem:[%s1612_s11 + $0x50] sm:$0xff] %vm319_vm0, %v938_v58 }
 0x31e   : > { %v939_v27 = vadd.f32 %v1604_v63, %v923_v26 }
 0x320   : > { %951 = vst.msk [vmem:[%s1612_s11 + $0x58] sm:$0xff] %vm319_vm0, %v939_v27 }
 0x321 PF: > { %s17_s21 = sadd.s32 1, %s1261_s21  }
 0x322   : > { %p14_p4 = scmp.ge.s32.totalorder %s17_s21, 4  }
 0x324   :  { %16 = sbr.rel (!%p14_p4) target bundleno = 1 (0x1), region = 82 }

</bundles_post_ra>
